<compile_context>
chip_gen: v6e
topology: v6e:2x2x1
jax: 0.10.0
libtpu: 0.0.40
codegen_flags: <defaults>
</compile_context>

<pallas_src>
import jax
import jax.numpy as jnp
from jax import lax
from jax.experimental import pallas as pl
from jax.experimental.pallas import tpu as pltpu


NUM_LAYERS = 4


# ----------------------------------------------------------------------------
# Fused wavefront kernel: 4 x LSTM + Linear(hidden, 1)
# ----------------------------------------------------------------------------
def make_fused_kernel(T, B, H, L=NUM_LAYERS):
    """Ref shapes:
      x_ref:    (T*B, D)      time-major input (row = t*B + b)
      wih0_ref: (D, L*4H)     layer-0 input->gates weights scattered into the
                              global gate layout (zero outside layer-0 columns)
      wbig_ref: (L*H, L*4H)   block matrix: diag = W_hh_l, superdiag = W_ih_{l+1}
      b_ref:    (1, L*4H)     combined biases (b_ih + b_hh), global layout
      wfc_ref:  (1, L*H)      FC weight embedded in the last layer's lane block
      bfc_ref:  (1, 1)        FC bias
      out_ref:  (B, 1)        model output
    Global gate layout: [I | F | O | G], each slab L*H lanes, layer l at l*H.
    """
    LH = L * H

    def kernel(x_ref, wih0_ref, wbig_ref, b_ref, wfc_ref, bfc_ref, out_ref):
        f32 = jnp.float32

        # Layer-0 input projection for ALL timesteps: one lane-dense GEMM.
        gx = jnp.dot(x_ref[...], wih0_ref[...],
                     preferred_element_type=f32)          # (T*B, L*4H)
        wbig = wbig_ref[...]                               # (L*H, L*4H)
        bias = b_ref[...]                                  # (1, L*4H)
        lane = lax.broadcasted_iota(jnp.int32, (1, LH), 1)

        h_all = jnp.zeros((B, LH), f32)   # layer l's h at lanes [l*H, (l+1)*H)
        c_all = jnp.zeros((B, LH), f32)

        # Wavefront: T + L - 1 steps, fully unrolled (T, L small and static).
        for s in range(T + L - 1):
            # One MXU call covers every layer's recurrent projection AND the
            # input projection from the previous layer's fresh h.
            gates = jnp.dot(h_all, wbig, preferred_element_type=f32) + bias
            if s < T:                      # layer-0's x contribution
                gates = gates + gx[s * B:(s + 1) * B, :]

            ifo = jax.nn.sigmoid(gates[:, :3 * LH])        # (B, 3*L*H) one EUP slab
            g_g = jnp.tanh(gates[:, 3 * LH:])              # (B, L*H)   one EUP slab
            i_g = ifo[:, :LH]
            f_g = ifo[:, LH:2 * LH]
            o_g = ifo[:, 2 * LH:3 * LH]

            c_new = f_g * c_all + i_g * g_g                # all layers at once
            h_new = o_g * jnp.tanh(c_new)

            # Layer l is active iff 0 <= s - l <= T-1  (static per unrolled step).
            lo = max(0, s - T + 1)
            hi = min(L - 1, s)
            if lo == 0 and hi == L - 1:                    # fully-active step
                c_all, h_all = c_new, h_new
            else:                                          # warm-up / drain
                active = (lane >= lo * H) & (lane < (hi + 1) * H)
                c_all = jnp.where(active, c_new, c_all)
                h_all = jnp.where(active, h_new, h_all)

        # Fused FC(hidden, 1): lane reduction against the zero-padded FC row
        # (only the last layer's lane block is nonzero).
        out_ref[...] = (jnp.sum(h_all * wfc_ref[...], axis=-1, keepdims=True)
                        + bfc_ref[...])

    return kernel


# ----------------------------------------------------------------------------
# Wrapper
# ----------------------------------------------------------------------------
@jax.jit
def deep_lstm_forward(x, params):
    """x: (B, T, input_size), batch_first like the PyTorch module."""
    B, T, D = x.shape
    L = NUM_LAYERS
    LH, LG = params["wbig"].shape
    H = LH // L

    # Time-major (T*B, D) so the layer-0 projection is one lane-dense GEMM.
    # TODO(synk): fold this transpose/reshape into a BlockSpec index_map once a
    # T-chunked grid is added (irrelevant while T*B is tiny).
    x_tm = jnp.transpose(x, (1, 0, 2)).reshape(T * B, D).astype(jnp.float32)

    n_steps = T + L - 1
    flops = int(2 * T * B * D * LG            # layer-0 input projection
                + 2 * n_steps * B * LH * LG   # wavefront block matmuls
                + 10 * n_steps * B * LH)      # gate / state elementwise
    transcendentals = int(5 * n_steps * B * LH)
    bytes_accessed = int(4 * (x_tm.size + params["wih0"].size
                              + params["wbig"].size + params["b"].size
                              + params["wfc"].size + params["bfc"].size + B))

    vmem = pl.BlockSpec(memory_space=pltpu.MemorySpace.VMEM)
    return pl.pallas_call(
        make_fused_kernel(T, B, H, L),
        out_shape=jax.ShapeDtypeStruct((B, 1), jnp.float32),
        in_specs=[vmem] * 6,
        out_specs=vmem,
        cost_estimate=pl.CostEstimate(flops=flops,
                                      transcendentals=transcendentals,
                                      bytes_accessed=bytes_accessed),
    )(x_tm, params["wih0"], params["wbig"], params["b"],
      params["wfc"], params["bfc"])


# ----------------------------------------------------------------------------
# Deterministic parameter init (PyTorch-style uniform(-1/sqrt(H), 1/sqrt(H))).
# Torch-gate-order (i, f, g, o) weights are kept for the reference; the kernel
# gets the block-structured / globally-repacked copies — pure repacking.
# ----------------------------------------------------------------------------
def init_params(key, input_size, hidden_size, num_layers=NUM_LAYERS):
    D, H, L = input_size, hidden_size, num_layers
    LH, LG = L * H, L * 4 * H
    bound = 1.0 / (H ** 0.5)
    # kernel gate index (i=0, f=1, o=2, g=3) -> torch column block (i, f, g, o)
    torch_block = {0: 0, 1: 1, 2: 3, 3: 2}

    wih0 = jnp.zeros((D, LG), jnp.float32)
    wbig = jnp.zeros((LH, LG), jnp.float32)
    b_all = jnp.zeros((1, LG), jnp.float32)
    ref_layers = []
    d_in = D
    for l in range(L):
        key, kw, ku, kbi, kbh = jax.random.split(key, 5)
        w_ih = jax.random.uniform(kw, (d_in, 4 * H), jnp.float32, -bound, bound)
        w_hh = jax.random.uniform(ku, (H, 4 * H), jnp.float32, -bound, bound)
        b = (jax.random.uniform(kbi, (4 * H,), jnp.float32, -bound, bound)
             + jax.random.uniform(kbh, (4 * H,), jnp.float32, -bound, bound))
        ref_layers.append({"wih": w_ih, "whh": w_hh, "b": b[None, :]})
        for k in range(4):
            t = torch_block[k]
            gcol = slice(k * LH + l * H, k * LH + (l + 1) * H)
            tcol = slice(t * H, (t + 1) * H)
            # Recurrent block (diagonal).
            wbig = wbig.at[l * H:(l + 1) * H, gcol].set(w_hh[:, tcol])
            if l == 0:
                # Layer-0 input projection, scattered into the global layout.
                wih0 = wih0.at[:, gcol].set(w_ih[:, tcol])
            else:
                # Feed-forward block (superdiagonal): h_{l-1}(t) -> layer l gates.
                wbig = wbig.at[(l - 1) * H:l * H, gcol].set(w_ih[:, tcol])
            b_all = b_all.at[0, gcol].set(b[tcol])
        d_in = H

    key, k5, k6 = jax.random.split(key, 3)
    w_fc = jax.random.uniform(k5, (1, H), jnp.float32, -bound, bound)
    b_fc = jax.random.uniform(k6, (1, 1), jnp.float32, -bound, bound)
    wfc_packed = jnp.zeros((1, LH), jnp.float32).at[:, (L - 1) * H:].set(w_fc)

    params = {
        "wih0": wih0,        # (D, L*4H)
        "wbig": wbig,        # (L*H, L*4H)
        "b": b_all,          # (1, L*4H)
        "wfc": wfc_packed,   # (1, L*H)
        "bfc": b_fc,         # (1, 1)
    }
    return params, ref_layers, w_fc, b_fc


# ----------------------------------------------------------------------------
# Pure-JAX reference (torch gate order, layer-serial) — correctness check only
# ----------------------------------------------------------------------------
def reference_forward(x, ref_layers, w_fc, b_fc):
    out = jnp.transpose(x, (1, 0, 2)).astype(jnp.float32)  # (T, B, D)
    for layer in ref_layers:
        H = layer["whh"].shape[0]
        B = out.shape[1]

        def step(carry, x_t, layer=layer, H=H):
            h, c = carry
            gates = x_t @ layer["wih"] + h @ layer["whh"] + layer["b"]
            i = jax.nn.sigmoid(gates[:, :H])
            f = jax.nn.sigmoid(gates[:, H:2 * H])
            g = jnp.tanh(gates[:, 2 * H:3 * H])
            o = jax.nn.sigmoid(gates[:, 3 * H:])
            c = f * c + i * g
            h = o * jnp.tanh(c)
            return (h, c), h

        init = (jnp.zeros((B, H), jnp.float32), jnp.zeros((B, H), jnp.float32))
        _, out = lax.scan(step, init, out)
    return out[-1] @ w_fc.T + b_fc


# ----------------------------------------------------------------------------
if __name__ == "__main__":
    B, T, INPUT_SIZE, HIDDEN = 2, 8, 4, 32

    key = jax.random.PRNGKey(0)
    key, kx = jax.random.split(key)
    x = jax.random.normal(kx, (B, T, INPUT_SIZE), jnp.float32)

    params, ref_layers, w_fc, b_fc = init_params(key, INPUT_SIZE, HIDDEN)

    y = jax.block_until_ready(deep_lstm_forward(x, params))
    y_ref = reference_forward(x, ref_layers, w_fc, b_fc)

    assert y.shape == (B, 1)
    assert jnp.allclose(y, y_ref, atol=1e-4, rtol=1e-4), (y, y_ref)

    print("KERNEL_OK")
</pallas_src>

<mosaic_0001>
module attributes {stable_mosaic.version = 11 : i64} {
  func.func @kernel(%arg0: memref<16x4xf32, #tpu.memory_space<vmem>>, %arg1: memref<4x512xf32, #tpu.memory_space<vmem>>, %arg2: memref<128x512xf32, #tpu.memory_space<vmem>>, %arg3: memref<1x512xf32, #tpu.memory_space<vmem>>, %arg4: memref<1x128xf32, #tpu.memory_space<vmem>>, %arg5: memref<1x1xf32, #tpu.memory_space<vmem>>, %arg6: memref<2x1xf32, #tpu.memory_space<vmem>>) attributes {dimension_semantics = [], scalar_prefetch = 0 : i64, scratch_operands = 0 : i64, tpu.core_type = #tpu.core_type<tc>} {
    %c0 = arith.constant 0 : index
    %c0_0 = arith.constant 0 : index
    %0 = vector.load %arg0[%c0, %c0_0] : memref<16x4xf32, #tpu.memory_space<vmem>>, vector<16x4xf32>
    %c0_1 = arith.constant 0 : index
    %c0_2 = arith.constant 0 : index
    %1 = vector.load %arg1[%c0_1, %c0_2] : memref<4x512xf32, #tpu.memory_space<vmem>>, vector<4x512xf32>
    %cst = arith.constant dense<0.000000e+00> : vector<16x512xf32>
    %2 = tpu.matmul %0, %1, %cst {dimension_numbers = #tpu.dot_dimension_numbers<[1], [0], [0], [1], [0, 0, 1, 1], [], []>} : vector<16x4xf32>, vector<4x512xf32>, vector<16x512xf32> -> vector<16x512xf32>
    %c0_3 = arith.constant 0 : index
    %c0_4 = arith.constant 0 : index
    %3 = vector.load %arg2[%c0_3, %c0_4] : memref<128x512xf32, #tpu.memory_space<vmem>>, vector<128x512xf32>
    %c0_5 = arith.constant 0 : index
    %c0_6 = arith.constant 0 : index
    %4 = vector.load %arg3[%c0_5, %c0_6] : memref<1x512xf32, #tpu.memory_space<vmem>>, vector<1x512xf32>
    %5 = tpu.iota {dimensions = array<i32: 1>} : vector<1x128xi32>
    %cst_7 = arith.constant 0.000000e+00 : f32
    %6 = vector.broadcast %cst_7 : f32 to vector<2x128xf32>
    %cst_8 = arith.constant 0.000000e+00 : f32
    %7 = vector.broadcast %cst_8 : f32 to vector<2x128xf32>
    %cst_9 = arith.constant dense<0.000000e+00> : vector<2x512xf32>
    %8 = tpu.matmul %6, %3, %cst_9 {dimension_numbers = #tpu.dot_dimension_numbers<[1], [0], [0], [1], [0, 0, 1, 1], [], []>} : vector<2x128xf32>, vector<128x512xf32>, vector<2x512xf32> -> vector<2x512xf32>
    %9 = vector.broadcast %4 : vector<1x512xf32> to vector<2x512xf32>
    %10 = arith.addf %8, %9 : vector<2x512xf32>
    %11 = vector.extract_strided_slice %2 {offsets = [0, 0], sizes = [2, 512], strides = [1, 1]} : vector<16x512xf32> to vector<2x512xf32>
    %12 = arith.addf %10, %11 : vector<2x512xf32>
    %13 = vector.extract_strided_slice %12 {offsets = [0, 0], sizes = [2, 384], strides = [1, 1]} : vector<2x512xf32> to vector<2x384xf32>
    %14 = arith.negf %13 : vector<2x384xf32>
    %15 = math.exp %14 : vector<2x384xf32>
    %cst_10 = arith.constant 1.000000e+00 : f32
    %16 = vector.broadcast %cst_10 : f32 to vector<2x384xf32>
    %17 = arith.addf %16, %15 : vector<2x384xf32>
    %18 = arith.divf %16, %17 : vector<2x384xf32>
    %19 = vector.extract_strided_slice %12 {offsets = [0, 384], sizes = [2, 128], strides = [1, 1]} : vector<2x512xf32> to vector<2x128xf32>
    %20 = math.tanh %19 : vector<2x128xf32>
    %21 = vector.extract_strided_slice %18 {offsets = [0, 0], sizes = [2, 128], strides = [1, 1]} : vector<2x384xf32> to vector<2x128xf32>
    %22 = vector.extract_strided_slice %18 {offsets = [0, 128], sizes = [2, 128], strides = [1, 1]} : vector<2x384xf32> to vector<2x128xf32>
    %23 = vector.extract_strided_slice %18 {offsets = [0, 256], sizes = [2, 128], strides = [1, 1]} : vector<2x384xf32> to vector<2x128xf32>
    %24 = arith.mulf %22, %7 : vector<2x128xf32>
    %25 = arith.mulf %21, %20 : vector<2x128xf32>
    %26 = arith.addf %24, %25 : vector<2x128xf32>
    %27 = math.tanh %26 : vector<2x128xf32>
    %28 = arith.mulf %23, %27 : vector<2x128xf32>
    %c0_i32 = arith.constant 0 : i32
    %29 = vector.broadcast %c0_i32 : i32 to vector<1x128xi32>
    %30 = arith.cmpi sge, %5, %29 : vector<1x128xi32>
    %c32_i32 = arith.constant 32 : i32
    %31 = vector.broadcast %c32_i32 : i32 to vector<1x128xi32>
    %32 = arith.cmpi slt, %5, %31 : vector<1x128xi32>
    %33 = arith.andi %30, %32 : vector<1x128xi1>
    %34 = vector.shape_cast %33 : vector<1x128xi1> to vector<1x128xi1>
    %35 = vector.broadcast %34 : vector<1x128xi1> to vector<2x128xi1>
    %36 = arith.select %35, %26, %7 : vector<2x128xi1>, vector<2x128xf32>
    %37 = vector.shape_cast %33 : vector<1x128xi1> to vector<1x128xi1>
    %38 = vector.broadcast %37 : vector<1x128xi1> to vector<2x128xi1>
    %39 = arith.select %38, %28, %6 : vector<2x128xi1>, vector<2x128xf32>
    %cst_11 = arith.constant dense<0.000000e+00> : vector<2x512xf32>
    %40 = tpu.matmul %39, %3, %cst_11 {dimension_numbers = #tpu.dot_dimension_numbers<[1], [0], [0], [1], [0, 0, 1, 1], [], []>} : vector<2x128xf32>, vector<128x512xf32>, vector<2x512xf32> -> vector<2x512xf32>
    %41 = vector.broadcast %4 : vector<1x512xf32> to vector<2x512xf32>
    %42 = arith.addf %40, %41 : vector<2x512xf32>
    %43 = vector.extract_strided_slice %2 {offsets = [2, 0], sizes = [2, 512], strides = [1, 1]} : vector<16x512xf32> to vector<2x512xf32>
    %44 = arith.addf %42, %43 : vector<2x512xf32>
    %45 = vector.extract_strided_slice %44 {offsets = [0, 0], sizes = [2, 384], strides = [1, 1]} : vector<2x512xf32> to vector<2x384xf32>
    %46 = arith.negf %45 : vector<2x384xf32>
    %47 = math.exp %46 : vector<2x384xf32>
    %cst_12 = arith.constant 1.000000e+00 : f32
    %48 = vector.broadcast %cst_12 : f32 to vector<2x384xf32>
    %49 = arith.addf %48, %47 : vector<2x384xf32>
    %50 = arith.divf %48, %49 : vector<2x384xf32>
    %51 = vector.extract_strided_slice %44 {offsets = [0, 384], sizes = [2, 128], strides = [1, 1]} : vector<2x512xf32> to vector<2x128xf32>
    %52 = math.tanh %51 : vector<2x128xf32>
    %53 = vector.extract_strided_slice %50 {offsets = [0, 0], sizes = [2, 128], strides = [1, 1]} : vector<2x384xf32> to vector<2x128xf32>
    %54 = vector.extract_strided_slice %50 {offsets = [0, 128], sizes = [2, 128], strides = [1, 1]} : vector<2x384xf32> to vector<2x128xf32>
    %55 = vector.extract_strided_slice %50 {offsets = [0, 256], sizes = [2, 128], strides = [1, 1]} : vector<2x384xf32> to vector<2x128xf32>
    %56 = arith.mulf %54, %36 : vector<2x128xf32>
    %57 = arith.mulf %53, %52 : vector<2x128xf32>
    %58 = arith.addf %56, %57 : vector<2x128xf32>
    %59 = math.tanh %58 : vector<2x128xf32>
    %60 = arith.mulf %55, %59 : vector<2x128xf32>
    %c0_i32_13 = arith.constant 0 : i32
    %61 = vector.broadcast %c0_i32_13 : i32 to vector<1x128xi32>
    %62 = arith.cmpi sge, %5, %61 : vector<1x128xi32>
    %c64_i32 = arith.constant 64 : i32
    %63 = vector.broadcast %c64_i32 : i32 to vector<1x128xi32>
    %64 = arith.cmpi slt, %5, %63 : vector<1x128xi32>
    %65 = arith.andi %62, %64 : vector<1x128xi1>
    %66 = vector.shape_cast %65 : vector<1x128xi1> to vector<1x128xi1>
    %67 = vector.broadcast %66 : vector<1x128xi1> to vector<2x128xi1>
    %68 = arith.select %67, %58, %36 : vector<2x128xi1>, vector<2x128xf32>
    %69 = vector.shape_cast %65 : vector<1x128xi1> to vector<1x128xi1>
    %70 = vector.broadcast %69 : vector<1x128xi1> to vector<2x128xi1>
    %71 = arith.select %70, %60, %39 : vector<2x128xi1>, vector<2x128xf32>
    %cst_14 = arith.constant dense<0.000000e+00> : vector<2x512xf32>
    %72 = tpu.matmul %71, %3, %cst_14 {dimension_numbers = #tpu.dot_dimension_numbers<[1], [0], [0], [1], [0, 0, 1, 1], [], []>} : vector<2x128xf32>, vector<128x512xf32>, vector<2x512xf32> -> vector<2x512xf32>
    %73 = vector.broadcast %4 : vector<1x512xf32> to vector<2x512xf32>
    %74 = arith.addf %72, %73 : vector<2x512xf32>
    %75 = vector.extract_strided_slice %2 {offsets = [4, 0], sizes = [2, 512], strides = [1, 1]} : vector<16x512xf32> to vector<2x512xf32>
    %76 = arith.addf %74, %75 : vector<2x512xf32>
    %77 = vector.extract_strided_slice %76 {offsets = [0, 0], sizes = [2, 384], strides = [1, 1]} : vector<2x512xf32> to vector<2x384xf32>
    %78 = arith.negf %77 : vector<2x384xf32>
    %79 = math.exp %78 : vector<2x384xf32>
    %cst_15 = arith.constant 1.000000e+00 : f32
    %80 = vector.broadcast %cst_15 : f32 to vector<2x384xf32>
    %81 = arith.addf %80, %79 : vector<2x384xf32>
    %82 = arith.divf %80, %81 : vector<2x384xf32>
    %83 = vector.extract_strided_slice %76 {offsets = [0, 384], sizes = [2, 128], strides = [1, 1]} : vector<2x512xf32> to vector<2x128xf32>
    %84 = math.tanh %83 : vector<2x128xf32>
    %85 = vector.extract_strided_slice %82 {offsets = [0, 0], sizes = [2, 128], strides = [1, 1]} : vector<2x384xf32> to vector<2x128xf32>
    %86 = vector.extract_strided_slice %82 {offsets = [0, 128], sizes = [2, 128], strides = [1, 1]} : vector<2x384xf32> to vector<2x128xf32>
    %87 = vector.extract_strided_slice %82 {offsets = [0, 256], sizes = [2, 128], strides = [1, 1]} : vector<2x384xf32> to vector<2x128xf32>
    %88 = arith.mulf %86, %68 : vector<2x128xf32>
    %89 = arith.mulf %85, %84 : vector<2x128xf32>
    %90 = arith.addf %88, %89 : vector<2x128xf32>
    %91 = math.tanh %90 : vector<2x128xf32>
    %92 = arith.mulf %87, %91 : vector<2x128xf32>
    %c0_i32_16 = arith.constant 0 : i32
    %93 = vector.broadcast %c0_i32_16 : i32 to vector<1x128xi32>
    %94 = arith.cmpi sge, %5, %93 : vector<1x128xi32>
    %c96_i32 = arith.constant 96 : i32
    %95 = vector.broadcast %c96_i32 : i32 to vector<1x128xi32>
    %96 = arith.cmpi slt, %5, %95 : vector<1x128xi32>
    %97 = arith.andi %94, %96 : vector<1x128xi1>
    %98 = vector.shape_cast %97 : vector<1x128xi1> to vector<1x128xi1>
    %99 = vector.broadcast %98 : vector<1x128xi1> to vector<2x128xi1>
    %100 = arith.select %99, %90, %68 : vector<2x128xi1>, vector<2x128xf32>
    %101 = vector.shape_cast %97 : vector<1x128xi1> to vector<1x128xi1>
    %102 = vector.broadcast %101 : vector<1x128xi1> to vector<2x128xi1>
    %103 = arith.select %102, %92, %71 : vector<2x128xi1>, vector<2x128xf32>
    %cst_17 = arith.constant dense<0.000000e+00> : vector<2x512xf32>
    %104 = tpu.matmul %103, %3, %cst_17 {dimension_numbers = #tpu.dot_dimension_numbers<[1], [0], [0], [1], [0, 0, 1, 1], [], []>} : vector<2x128xf32>, vector<128x512xf32>, vector<2x512xf32> -> vector<2x512xf32>
    %105 = vector.broadcast %4 : vector<1x512xf32> to vector<2x512xf32>
    %106 = arith.addf %104, %105 : vector<2x512xf32>
    %107 = vector.extract_strided_slice %2 {offsets = [6, 0], sizes = [2, 512], strides = [1, 1]} : vector<16x512xf32> to vector<2x512xf32>
    %108 = arith.addf %106, %107 : vector<2x512xf32>
    %109 = vector.extract_strided_slice %108 {offsets = [0, 0], sizes = [2, 384], strides = [1, 1]} : vector<2x512xf32> to vector<2x384xf32>
    %110 = arith.negf %109 : vector<2x384xf32>
    %111 = math.exp %110 : vector<2x384xf32>
    %cst_18 = arith.constant 1.000000e+00 : f32
    %112 = vector.broadcast %cst_18 : f32 to vector<2x384xf32>
    %113 = arith.addf %112, %111 : vector<2x384xf32>
    %114 = arith.divf %112, %113 : vector<2x384xf32>
    %115 = vector.extract_strided_slice %108 {offsets = [0, 384], sizes = [2, 128], strides = [1, 1]} : vector<2x512xf32> to vector<2x128xf32>
    %116 = math.tanh %115 : vector<2x128xf32>
    %117 = vector.extract_strided_slice %114 {offsets = [0, 0], sizes = [2, 128], strides = [1, 1]} : vector<2x384xf32> to vector<2x128xf32>
    %118 = vector.extract_strided_slice %114 {offsets = [0, 128], sizes = [2, 128], strides = [1, 1]} : vector<2x384xf32> to vector<2x128xf32>
    %119 = vector.extract_strided_slice %114 {offsets = [0, 256], sizes = [2, 128], strides = [1, 1]} : vector<2x384xf32> to vector<2x128xf32>
    %120 = arith.mulf %118, %100 : vector<2x128xf32>
    %121 = arith.mulf %117, %116 : vector<2x128xf32>
    %122 = arith.addf %120, %121 : vector<2x128xf32>
    %123 = math.tanh %122 : vector<2x128xf32>
    %124 = arith.mulf %119, %123 : vector<2x128xf32>
    %cst_19 = arith.constant dense<0.000000e+00> : vector<2x512xf32>
    %125 = tpu.matmul %124, %3, %cst_19 {dimension_numbers = #tpu.dot_dimension_numbers<[1], [0], [0], [1], [0, 0, 1, 1], [], []>} : vector<2x128xf32>, vector<128x512xf32>, vector<2x512xf32> -> vector<2x512xf32>
    %126 = vector.broadcast %4 : vector<1x512xf32> to vector<2x512xf32>
    %127 = arith.addf %125, %126 : vector<2x512xf32>
    %128 = vector.extract_strided_slice %2 {offsets = [8, 0], sizes = [2, 512], strides = [1, 1]} : vector<16x512xf32> to vector<2x512xf32>
    %129 = arith.addf %127, %128 : vector<2x512xf32>
    %130 = vector.extract_strided_slice %129 {offsets = [0, 0], sizes = [2, 384], strides = [1, 1]} : vector<2x512xf32> to vector<2x384xf32>
    %131 = arith.negf %130 : vector<2x384xf32>
    %132 = math.exp %131 : vector<2x384xf32>
    %cst_20 = arith.constant 1.000000e+00 : f32
    %133 = vector.broadcast %cst_20 : f32 to vector<2x384xf32>
    %134 = arith.addf %133, %132 : vector<2x384xf32>
    %135 = arith.divf %133, %134 : vector<2x384xf32>
    %136 = vector.extract_strided_slice %129 {offsets = [0, 384], sizes = [2, 128], strides = [1, 1]} : vector<2x512xf32> to vector<2x128xf32>
    %137 = math.tanh %136 : vector<2x128xf32>
    %138 = vector.extract_strided_slice %135 {offsets = [0, 0], sizes = [2, 128], strides = [1, 1]} : vector<2x384xf32> to vector<2x128xf32>
    %139 = vector.extract_strided_slice %135 {offsets = [0, 128], sizes = [2, 128], strides = [1, 1]} : vector<2x384xf32> to vector<2x128xf32>
    %140 = vector.extract_strided_slice %135 {offsets = [0, 256], sizes = [2, 128], strides = [1, 1]} : vector<2x384xf32> to vector<2x128xf32>
    %141 = arith.mulf %139, %122 : vector<2x128xf32>
    %142 = arith.mulf %138, %137 : vector<2x128xf32>
    %143 = arith.addf %141, %142 : vector<2x128xf32>
    %144 = math.tanh %143 : vector<2x128xf32>
    %145 = arith.mulf %140, %144 : vector<2x128xf32>
    %cst_21 = arith.constant dense<0.000000e+00> : vector<2x512xf32>
    %146 = tpu.matmul %145, %3, %cst_21 {dimension_numbers = #tpu.dot_dimension_numbers<[1], [0], [0], [1], [0, 0, 1, 1], [], []>} : vector<2x128xf32>, vector<128x512xf32>, vector<2x512xf32> -> vector<2x512xf32>
    %147 = vector.broadcast %4 : vector<1x512xf32> to vector<2x512xf32>
    %148 = arith.addf %146, %147 : vector<2x512xf32>
    %149 = vector.extract_strided_slice %2 {offsets = [10, 0], sizes = [2, 512], strides = [1, 1]} : vector<16x512xf32> to vector<2x512xf32>
    %150 = arith.addf %148, %149 : vector<2x512xf32>
    %151 = vector.extract_strided_slice %150 {offsets = [0, 0], sizes = [2, 384], strides = [1, 1]} : vector<2x512xf32> to vector<2x384xf32>
    %152 = arith.negf %151 : vector<2x384xf32>
    %153 = math.exp %152 : vector<2x384xf32>
    %cst_22 = arith.constant 1.000000e+00 : f32
    %154 = vector.broadcast %cst_22 : f32 to vector<2x384xf32>
    %155 = arith.addf %154, %153 : vector<2x384xf32>
    %156 = arith.divf %154, %155 : vector<2x384xf32>
    %157 = vector.extract_strided_slice %150 {offsets = [0, 384], sizes = [2, 128], strides = [1, 1]} : vector<2x512xf32> to vector<2x128xf32>
    %158 = math.tanh %157 : vector<2x128xf32>
    %159 = vector.extract_strided_slice %156 {offsets = [0, 0], sizes = [2, 128], strides = [1, 1]} : vector<2x384xf32> to vector<2x128xf32>
    %160 = vector.extract_strided_slice %156 {offsets = [0, 128], sizes = [2, 128], strides = [1, 1]} : vector<2x384xf32> to vector<2x128xf32>
    %161 = vector.extract_strided_slice %156 {offsets = [0, 256], sizes = [2, 128], strides = [1, 1]} : vector<2x384xf32> to vector<2x128xf32>
    %162 = arith.mulf %160, %143 : vector<2x128xf32>
    %163 = arith.mulf %159, %158 : vector<2x128xf32>
    %164 = arith.addf %162, %163 : vector<2x128xf32>
    %165 = math.tanh %164 : vector<2x128xf32>
    %166 = arith.mulf %161, %165 : vector<2x128xf32>
    %cst_23 = arith.constant dense<0.000000e+00> : vector<2x512xf32>
    %167 = tpu.matmul %166, %3, %cst_23 {dimension_numbers = #tpu.dot_dimension_numbers<[1], [0], [0], [1], [0, 0, 1, 1], [], []>} : vector<2x128xf32>, vector<128x512xf32>, vector<2x512xf32> -> vector<2x512xf32>
    %168 = vector.broadcast %4 : vector<1x512xf32> to vector<2x512xf32>
    %169 = arith.addf %167, %168 : vector<2x512xf32>
    %170 = vector.extract_strided_slice %2 {offsets = [12, 0], sizes = [2, 512], strides = [1, 1]} : vector<16x512xf32> to vector<2x512xf32>
    %171 = arith.addf %169, %170 : vector<2x512xf32>
    %172 = vector.extract_strided_slice %171 {offsets = [0, 0], sizes = [2, 384], strides = [1, 1]} : vector<2x512xf32> to vector<2x384xf32>
    %173 = arith.negf %172 : vector<2x384xf32>
    %174 = math.exp %173 : vector<2x384xf32>
    %cst_24 = arith.constant 1.000000e+00 : f32
    %175 = vector.broadcast %cst_24 : f32 to vector<2x384xf32>
    %176 = arith.addf %175, %174 : vector<2x384xf32>
    %177 = arith.divf %175, %176 : vector<2x384xf32>
    %178 = vector.extract_strided_slice %171 {offsets = [0, 384], sizes = [2, 128], strides = [1, 1]} : vector<2x512xf32> to vector<2x128xf32>
    %179 = math.tanh %178 : vector<2x128xf32>
    %180 = vector.extract_strided_slice %177 {offsets = [0, 0], sizes = [2, 128], strides = [1, 1]} : vector<2x384xf32> to vector<2x128xf32>
    %181 = vector.extract_strided_slice %177 {offsets = [0, 128], sizes = [2, 128], strides = [1, 1]} : vector<2x384xf32> to vector<2x128xf32>
    %182 = vector.extract_strided_slice %177 {offsets = [0, 256], sizes = [2, 128], strides = [1, 1]} : vector<2x384xf32> to vector<2x128xf32>
    %183 = arith.mulf %181, %164 : vector<2x128xf32>
    %184 = arith.mulf %180, %179 : vector<2x128xf32>
    %185 = arith.addf %183, %184 : vector<2x128xf32>
    %186 = math.tanh %185 : vector<2x128xf32>
    %187 = arith.mulf %182, %186 : vector<2x128xf32>
    %cst_25 = arith.constant dense<0.000000e+00> : vector<2x512xf32>
    %188 = tpu.matmul %187, %3, %cst_25 {dimension_numbers = #tpu.dot_dimension_numbers<[1], [0], [0], [1], [0, 0, 1, 1], [], []>} : vector<2x128xf32>, vector<128x512xf32>, vector<2x512xf32> -> vector<2x512xf32>
    %189 = vector.broadcast %4 : vector<1x512xf32> to vector<2x512xf32>
    %190 = arith.addf %188, %189 : vector<2x512xf32>
    %191 = vector.extract_strided_slice %2 {offsets = [14, 0], sizes = [2, 512], strides = [1, 1]} : vector<16x512xf32> to vector<2x512xf32>
    %192 = arith.addf %190, %191 : vector<2x512xf32>
    %193 = vector.extract_strided_slice %192 {offsets = [0, 0], sizes = [2, 384], strides = [1, 1]} : vector<2x512xf32> to vector<2x384xf32>
    %194 = arith.negf %193 : vector<2x384xf32>
    %195 = math.exp %194 : vector<2x384xf32>
    %cst_26 = arith.constant 1.000000e+00 : f32
    %196 = vector.broadcast %cst_26 : f32 to vector<2x384xf32>
    %197 = arith.addf %196, %195 : vector<2x384xf32>
    %198 = arith.divf %196, %197 : vector<2x384xf32>
    %199 = vector.extract_strided_slice %192 {offsets = [0, 384], sizes = [2, 128], strides = [1, 1]} : vector<2x512xf32> to vector<2x128xf32>
    %200 = math.tanh %199 : vector<2x128xf32>
    %201 = vector.extract_strided_slice %198 {offsets = [0, 0], sizes = [2, 128], strides = [1, 1]} : vector<2x384xf32> to vector<2x128xf32>
    %202 = vector.extract_strided_slice %198 {offsets = [0, 128], sizes = [2, 128], strides = [1, 1]} : vector<2x384xf32> to vector<2x128xf32>
    %203 = vector.extract_strided_slice %198 {offsets = [0, 256], sizes = [2, 128], strides = [1, 1]} : vector<2x384xf32> to vector<2x128xf32>
    %204 = arith.mulf %202, %185 : vector<2x128xf32>
    %205 = arith.mulf %201, %200 : vector<2x128xf32>
    %206 = arith.addf %204, %205 : vector<2x128xf32>
    %207 = math.tanh %206 : vector<2x128xf32>
    %208 = arith.mulf %203, %207 : vector<2x128xf32>
    %cst_27 = arith.constant dense<0.000000e+00> : vector<2x512xf32>
    %209 = tpu.matmul %208, %3, %cst_27 {dimension_numbers = #tpu.dot_dimension_numbers<[1], [0], [0], [1], [0, 0, 1, 1], [], []>} : vector<2x128xf32>, vector<128x512xf32>, vector<2x512xf32> -> vector<2x512xf32>
    %210 = vector.broadcast %4 : vector<1x512xf32> to vector<2x512xf32>
    %211 = arith.addf %209, %210 : vector<2x512xf32>
    %212 = vector.extract_strided_slice %211 {offsets = [0, 0], sizes = [2, 384], strides = [1, 1]} : vector<2x512xf32> to vector<2x384xf32>
    %213 = arith.negf %212 : vector<2x384xf32>
    %214 = math.exp %213 : vector<2x384xf32>
    %cst_28 = arith.constant 1.000000e+00 : f32
    %215 = vector.broadcast %cst_28 : f32 to vector<2x384xf32>
    %216 = arith.addf %215, %214 : vector<2x384xf32>
    %217 = arith.divf %215, %216 : vector<2x384xf32>
    %218 = vector.extract_strided_slice %211 {offsets = [0, 384], sizes = [2, 128], strides = [1, 1]} : vector<2x512xf32> to vector<2x128xf32>
    %219 = math.tanh %218 : vector<2x128xf32>
    %220 = vector.extract_strided_slice %217 {offsets = [0, 0], sizes = [2, 128], strides = [1, 1]} : vector<2x384xf32> to vector<2x128xf32>
    %221 = vector.extract_strided_slice %217 {offsets = [0, 128], sizes = [2, 128], strides = [1, 1]} : vector<2x384xf32> to vector<2x128xf32>
    %222 = vector.extract_strided_slice %217 {offsets = [0, 256], sizes = [2, 128], strides = [1, 1]} : vector<2x384xf32> to vector<2x128xf32>
    %223 = arith.mulf %221, %206 : vector<2x128xf32>
    %224 = arith.mulf %220, %219 : vector<2x128xf32>
    %225 = arith.addf %223, %224 : vector<2x128xf32>
    %226 = math.tanh %225 : vector<2x128xf32>
    %227 = arith.mulf %222, %226 : vector<2x128xf32>
    %c32_i32_29 = arith.constant 32 : i32
    %228 = vector.broadcast %c32_i32_29 : i32 to vector<1x128xi32>
    %229 = arith.cmpi sge, %5, %228 : vector<1x128xi32>
    %c128_i32 = arith.constant 128 : i32
    %230 = vector.broadcast %c128_i32 : i32 to vector<1x128xi32>
    %231 = arith.cmpi slt, %5, %230 : vector<1x128xi32>
    %232 = arith.andi %229, %231 : vector<1x128xi1>
    %233 = vector.shape_cast %232 : vector<1x128xi1> to vector<1x128xi1>
    %234 = vector.broadcast %233 : vector<1x128xi1> to vector<2x128xi1>
    %235 = arith.select %234, %225, %206 : vector<2x128xi1>, vector<2x128xf32>
    %236 = vector.shape_cast %232 : vector<1x128xi1> to vector<1x128xi1>
    %237 = vector.broadcast %236 : vector<1x128xi1> to vector<2x128xi1>
    %238 = arith.select %237, %227, %208 : vector<2x128xi1>, vector<2x128xf32>
    %cst_30 = arith.constant dense<0.000000e+00> : vector<2x512xf32>
    %239 = tpu.matmul %238, %3, %cst_30 {dimension_numbers = #tpu.dot_dimension_numbers<[1], [0], [0], [1], [0, 0, 1, 1], [], []>} : vector<2x128xf32>, vector<128x512xf32>, vector<2x512xf32> -> vector<2x512xf32>
    %240 = vector.broadcast %4 : vector<1x512xf32> to vector<2x512xf32>
    %241 = arith.addf %239, %240 : vector<2x512xf32>
    %242 = vector.extract_strided_slice %241 {offsets = [0, 0], sizes = [2, 384], strides = [1, 1]} : vector<2x512xf32> to vector<2x384xf32>
    %243 = arith.negf %242 : vector<2x384xf32>
    %244 = math.exp %243 : vector<2x384xf32>
    %cst_31 = arith.constant 1.000000e+00 : f32
    %245 = vector.broadcast %cst_31 : f32 to vector<2x384xf32>
    %246 = arith.addf %245, %244 : vector<2x384xf32>
    %247 = arith.divf %245, %246 : vector<2x384xf32>
    %248 = vector.extract_strided_slice %241 {offsets = [0, 384], sizes = [2, 128], strides = [1, 1]} : vector<2x512xf32> to vector<2x128xf32>
    %249 = math.tanh %248 : vector<2x128xf32>
    %250 = vector.extract_strided_slice %247 {offsets = [0, 0], sizes = [2, 128], strides = [1, 1]} : vector<2x384xf32> to vector<2x128xf32>
    %251 = vector.extract_strided_slice %247 {offsets = [0, 128], sizes = [2, 128], strides = [1, 1]} : vector<2x384xf32> to vector<2x128xf32>
    %252 = vector.extract_strided_slice %247 {offsets = [0, 256], sizes = [2, 128], strides = [1, 1]} : vector<2x384xf32> to vector<2x128xf32>
    %253 = arith.mulf %251, %235 : vector<2x128xf32>
    %254 = arith.mulf %250, %249 : vector<2x128xf32>
    %255 = arith.addf %253, %254 : vector<2x128xf32>
    %256 = math.tanh %255 : vector<2x128xf32>
    %257 = arith.mulf %252, %256 : vector<2x128xf32>
    %c64_i32_32 = arith.constant 64 : i32
    %258 = vector.broadcast %c64_i32_32 : i32 to vector<1x128xi32>
    %259 = arith.cmpi sge, %5, %258 : vector<1x128xi32>
    %c128_i32_33 = arith.constant 128 : i32
    %260 = vector.broadcast %c128_i32_33 : i32 to vector<1x128xi32>
    %261 = arith.cmpi slt, %5, %260 : vector<1x128xi32>
    %262 = arith.andi %259, %261 : vector<1x128xi1>
    %263 = vector.shape_cast %262 : vector<1x128xi1> to vector<1x128xi1>
    %264 = vector.broadcast %263 : vector<1x128xi1> to vector<2x128xi1>
    %265 = arith.select %264, %255, %235 : vector<2x128xi1>, vector<2x128xf32>
    %266 = vector.shape_cast %262 : vector<1x128xi1> to vector<1x128xi1>
    %267 = vector.broadcast %266 : vector<1x128xi1> to vector<2x128xi1>
    %268 = arith.select %267, %257, %238 : vector<2x128xi1>, vector<2x128xf32>
    %cst_34 = arith.constant dense<0.000000e+00> : vector<2x512xf32>
    %269 = tpu.matmul %268, %3, %cst_34 {dimension_numbers = #tpu.dot_dimension_numbers<[1], [0], [0], [1], [0, 0, 1, 1], [], []>} : vector<2x128xf32>, vector<128x512xf32>, vector<2x512xf32> -> vector<2x512xf32>
    %270 = vector.broadcast %4 : vector<1x512xf32> to vector<2x512xf32>
    %271 = arith.addf %269, %270 : vector<2x512xf32>
    %272 = vector.extract_strided_slice %271 {offsets = [0, 0], sizes = [2, 384], strides = [1, 1]} : vector<2x512xf32> to vector<2x384xf32>
    %273 = arith.negf %272 : vector<2x384xf32>
    %274 = math.exp %273 : vector<2x384xf32>
    %cst_35 = arith.constant 1.000000e+00 : f32
    %275 = vector.broadcast %cst_35 : f32 to vector<2x384xf32>
    %276 = arith.addf %275, %274 : vector<2x384xf32>
    %277 = arith.divf %275, %276 : vector<2x384xf32>
    %278 = vector.extract_strided_slice %271 {offsets = [0, 384], sizes = [2, 128], strides = [1, 1]} : vector<2x512xf32> to vector<2x128xf32>
    %279 = math.tanh %278 : vector<2x128xf32>
    %280 = vector.extract_strided_slice %277 {offsets = [0, 0], sizes = [2, 128], strides = [1, 1]} : vector<2x384xf32> to vector<2x128xf32>
    %281 = vector.extract_strided_slice %277 {offsets = [0, 128], sizes = [2, 128], strides = [1, 1]} : vector<2x384xf32> to vector<2x128xf32>
    %282 = vector.extract_strided_slice %277 {offsets = [0, 256], sizes = [2, 128], strides = [1, 1]} : vector<2x384xf32> to vector<2x128xf32>
    %283 = arith.mulf %281, %265 : vector<2x128xf32>
    %284 = arith.mulf %280, %279 : vector<2x128xf32>
    %285 = arith.addf %283, %284 : vector<2x128xf32>
    %286 = math.tanh %285 : vector<2x128xf32>
    %287 = arith.mulf %282, %286 : vector<2x128xf32>
    %c96_i32_36 = arith.constant 96 : i32
    %288 = vector.broadcast %c96_i32_36 : i32 to vector<1x128xi32>
    %289 = arith.cmpi sge, %5, %288 : vector<1x128xi32>
    %c128_i32_37 = arith.constant 128 : i32
    %290 = vector.broadcast %c128_i32_37 : i32 to vector<1x128xi32>
    %291 = arith.cmpi slt, %5, %290 : vector<1x128xi32>
    %292 = arith.andi %289, %291 : vector<1x128xi1>
    %293 = vector.shape_cast %292 : vector<1x128xi1> to vector<1x128xi1>
    %294 = vector.broadcast %293 : vector<1x128xi1> to vector<2x128xi1>
    %295 = arith.select %294, %287, %268 : vector<2x128xi1>, vector<2x128xf32>
    %c0_38 = arith.constant 0 : index
    %c0_39 = arith.constant 0 : index
    %296 = vector.load %arg4[%c0_38, %c0_39] : memref<1x128xf32, #tpu.memory_space<vmem>>, vector<1x128xf32>
    %297 = vector.broadcast %296 : vector<1x128xf32> to vector<2x128xf32>
    %298 = arith.mulf %295, %297 : vector<2x128xf32>
    %cst_40 = arith.constant dense<0.000000e+00> : vector<2xf32>
    %299 = vector.multi_reduction <add>, %298, %cst_40 [1] : vector<2x128xf32> to vector<2xf32>
    %300 = vector.shape_cast %299 : vector<2xf32> to vector<2x1xf32>
    %c0_41 = arith.constant 0 : index
    %c0_42 = arith.constant 0 : index
    %301 = vector.load %arg5[%c0_41, %c0_42] : memref<1x1xf32, #tpu.memory_space<vmem>>, vector<1x1xf32>
    %302 = vector.broadcast %301 : vector<1x1xf32> to vector<2x1xf32>
    %303 = arith.addf %300, %302 : vector<2x1xf32>
    %c0_43 = arith.constant 0 : index
    %c0_44 = arith.constant 0 : index
    %304 = vector.load %arg6[%c0_43, %c0_44] : memref<2x1xf32, #tpu.memory_space<vmem>>, vector<2x1xf32>
    tpu.vector_store %arg6[%c0_43, %c0_44], %303 {strides = array<i32>} : memref<2x1xf32, #tpu.memory_space<vmem>>, vector<2x1xf32>,
    return
  }
}

</mosaic_0001>

<bundles_post_ra>
// kernel: deep_lstm_forward.1
= control target key start
LH: loop header
LB: loop body
LE: loop exit
PB: predicated region body
PF: predicated region fallthrough
CT: control target
= control target key end

     0   :  { %s3816_s0 = inlined_call_operand.vmem [shape: f32[16,4], index: 0, kind: input, shape index: {}]   ;;  %s3817_s1 = inlined_call_operand.vmem [shape: f32[4,512], index: 1, kind: input, shape index: {}]   ;;  %s3818_s2 = inlined_call_operand.hbm [shape: f32[128,512], index: 2, kind: input, shape index: {}]   ;;  %s3819_s3 = inlined_call_operand.vmem [shape: f32[1,512], index: 3, kind: input, shape index: {}]   ;;  %s3820_s4 = inlined_call_operand.vmem [shape: f32[1,128], index: 4, kind: input, shape index: {}]   ;;  %s3821_s5 = inlined_call_operand.<no memory space> [shape: f32[1,1], index: 5, kind: input, shape index: {}]   ;;  %s3822_s6 = inlined_call_operand.vmem [shape: f32[2,1], index: 6, kind: output, shape index: {}]  }
   0x1   :  { %v11_v0 = vstv %s3821_s5 }
   0x2   :  { %12 = vst [vmem:[#allocation2] sm:$0x1] %v11_v0 }
   0x3   :  { %13 = vsyncpa [#allocation4], 0  ;;  %s2660_s23 = smov [#allocation3]  }
   0x4   :  { %s23_s24 = sshll.u32 %s2660_s23, 4  ;;  %s24_s24 = int_to_ptr.vmem [resolvable:$true] %s23_s24 }
   0x5   :  { %s2646_s25 = scalar_lea.vmem %s24_s24, 8192  ;;  %p2651_p1 = scmp.lt.s32.totalorder %s24_s24, %s24_s24 }
   0x6   :  { %p2647_p0 = scmp.ne.s32.totalorder %s24_s24, %s2646_s25  ;;  %p2652_p2 = scmp.lt.s32.totalorder %s2646_s25, %s2646_s25 }
   0x8   :  { %p2653_p3 = por %p2652_p2, %p2651_p1 }
   0xa   :  { %p2654_p4 = pnand %p2653_p3, %p2647_p0 }
   0xc   :  { %2657 = shalt.err (!%p2654_p4)
}
   0xd   :  { %s2661_s26 = smov 512   ;;  %s2662_s27 = smov 32  }
   0xe   :  { %29 = dma.hbm_to_vmem [thread:$0]  %s3818_s2, 8192, %s24_s24, [#allocation4], %s2661_s26, %s2661_s26, %s2662_s27  }
   0xf   :  { %2658 = dma.done.wait [#allocation4], 8192  }
  0x10   :  { %2659 = vsyncadd [#allocation4], 4294959104  ;;  %v3825_v1 = vmov 0.0   ;;  %v41_v2 = vld [vmem:[%s3817_s1] sm:$0xff]  ;;  %vm54_vm0 = vcmask 1043456   ;;  %v42_v3 = vld [vmem:[%s3817_s1 + $0x8] sm:$0xff] }
  0x11   :  { %127 = vmatprep.mubr.f32.mxu0 %v3825_v1  ;;  %204 = vmatprep.mubr.f32.mxu1 %v3825_v1  ;;  %v45_v4 = vcombine.high %v41_v2, %v41_v2  ;;  %v46_v5 = vcombine.high %v42_v3, %v42_v3  ;;  %v39_v6 = vld [vmem:[%s3816_s0] sm:$0xff]  ;;  %vm47_vm1 = vcmask 31744   ;;  %v2716_v7 = vld [vmem:[#allocation3 + $0x1e8] sm:$0xff]  ;;  %v2722_v10 = vld [vmem:[#allocation3 + $0x1f0] sm:$0xff]  ;;  %vm2264_vm8 = vcmask 1041408  }
  0x12   :  { %3944 = vst [vmem:[#allocation6_spill] sm:$0xff] %v2716_v7  ;;  %v2718_v8 = vld [vmem:[#allocation3 + $0x1f8] sm:$0xff]  ;;  %v2720_v9 = vld [vmem:[#allocation3 + $0x1e0] sm:$0xff]  ;;  %v2726_v11 = vld [vmem:[#allocation3 + $0x1c8] sm:$0xff]  ;;  %vm2276_vm9 = vcmask 1024  }
  0x13   :  { %2283 = vmatprep.subr.msk.mxu0 %vm54_vm0, %v45_v4  ;;  %2287 = vmatprep.subr.msk.mxu1 %vm54_vm0, %v46_v5  ;;  %3945 = vst [vmem:[#allocation7_spill] sm:$0xff] %v2718_v8  ;;  %v2728_v12 = vld [vmem:[#allocation3 + $0x1d8] sm:$0xff]  ;;  %v2732_v13 = vld [vmem:[#allocation3 + $0x1c0] sm:$0xff]  ;;  %v2734_v14 = vld [vmem:[#allocation3 + $0x1d0] sm:$0xff] }
  0x14   :  { %2284 = vmatpush1.msk.msra.mxu0 %vm54_vm0, %v41_v2  ;;  %2288 = vmatpush1.msk.msra.mxu1 %vm54_vm0, %v42_v3  ;;  %v2738_v15 = vld [vmem:[#allocation3 + $0x1a8] sm:$0xff]  ;;  %v2740_v16 = vld [vmem:[#allocation3 + $0x1b8] sm:$0xff]  ;;  %v2744_v17 = vld [vmem:[#allocation3 + $0x1a0] sm:$0xff] }
  0x15   :  { %2285 = vmatmul.mubr.msk.f32.vlgmr.msra.gmra.mxu0 %vm47_vm1, %v39_v6  ;;  %305 = vmatprep.subr.mxu0 %v2716_v7  ;;  %v2746_v18 = vld [vmem:[#allocation3 + $0x1b0] sm:$0xff]  ;;  %v2750_v19 = vld [vmem:[#allocation3 + $0x188] sm:$0xff]  ;;  %v2752_v20 = vld [vmem:[#allocation3 + $0x198] sm:$0xff] }
  0x16   :  { %376 = vmatprep.subr.mxu1 %v2718_v8  ;;  %2289 = vmatmul.mubr.msk.f32.vlgmr.msra.gmra.mxu1 %vm47_vm1, %v39_v6  ;;  %v2756_v21 = vld [vmem:[#allocation3 + $0x180] sm:$0xff]  ;;  %v2758_v22 = vld [vmem:[#allocation3 + $0x190] sm:$0xff]  ;;  %v2762_v23 = vld [vmem:[#allocation3 + $0x168] sm:$0xff] }
  0x17   :  { %306 = vmatpush1.msra.mxu0 %v2720_v9  ;;  %377 = vmatpush1.msra.mxu1 %v2722_v10  ;;  %v2764_v24 = vld [vmem:[#allocation3 + $0x178] sm:$0xff]  ;;  %v2768_v25 = vld [vmem:[#allocation3 + $0x160] sm:$0xff]  ;;  %v2770_v26 = vld [vmem:[#allocation3 + $0x170] sm:$0xff] }
  0x18   :  { %307 = vmatprep.subr.mxu0 %v2726_v11  ;;  %378 = vmatprep.subr.mxu1 %v2728_v12  ;;  %v2774_v27 = vld [vmem:[#allocation3 + $0x148] sm:$0xff]  ;;  %v2776_v28 = vld [vmem:[#allocation3 + $0x158] sm:$0xff]  ;;  %v2780_v29 = vld [vmem:[#allocation3 + $0x140] sm:$0xff] }
  0x19   :  { %308 = vmatpush1.msra.mxu0 %v2732_v13  ;;  %379 = vmatpush1.msra.mxu1 %v2734_v14  ;;  %v2782_v30 = vld [vmem:[#allocation3 + $0x150] sm:$0xff]  ;;  %v2786_v31 = vld [vmem:[#allocation3 + $0x128] sm:$0xff]  ;;  %v2788_v32 = vld [vmem:[#allocation3 + $0x138] sm:$0xff] }
  0x1a   :  { %309 = vmatprep.subr.mxu0 %v2738_v15  ;;  %380 = vmatprep.subr.mxu1 %v2740_v16  ;;  %v2792_v33 = vld [vmem:[#allocation3 + $0x120] sm:$0xff]  ;;  %v2794_v34 = vld [vmem:[#allocation3 + $0x130] sm:$0xff]  ;;  %v2798_v35 = vld [vmem:[#allocation3 + $0x108] sm:$0xff] }
  0x1b   :  { %310 = vmatpush1.msra.mxu0 %v2744_v17  ;;  %381 = vmatpush1.msra.mxu1 %v2746_v18  ;;  %v2800_v36 = vld [vmem:[#allocation3 + $0x118] sm:$0xff]  ;;  %v2804_v37 = vld [vmem:[#allocation3 + $0x100] sm:$0xff]  ;;  %v2806_v38 = vld [vmem:[#allocation3 + $0x110] sm:$0xff] }
  0x1c   :  { %311 = vmatprep.subr.mxu0 %v2750_v19  ;;  %382 = vmatprep.subr.mxu1 %v2752_v20  ;;  %v2810_v39 = vld [vmem:[#allocation3 + $0xe8] sm:$0xff]  ;;  %v2812_v40 = vld [vmem:[#allocation3 + $0xf8] sm:$0xff]  ;;  %v2816_v41 = vld [vmem:[#allocation3 + $0xe0] sm:$0xff] }
  0x1d   :  { %312 = vmatpush1.msra.mxu0 %v2756_v21  ;;  %383 = vmatpush1.msra.mxu1 %v2758_v22  ;;  %v2818_v42 = vld [vmem:[#allocation3 + $0xf0] sm:$0xff]  ;;  %v2822_v43 = vld [vmem:[#allocation3 + $0xc8] sm:$0xff]  ;;  %v2824_v44 = vld [vmem:[#allocation3 + $0xd8] sm:$0xff] }
  0x1e   :  { %313 = vmatprep.subr.mxu0 %v2762_v23  ;;  %384 = vmatprep.subr.mxu1 %v2764_v24  ;;  %v2828_v45 = vld [vmem:[#allocation3 + $0xc0] sm:$0xff]  ;;  %v2830_v46 = vld [vmem:[#allocation3 + $0xd0] sm:$0xff]  ;;  %v2834_v47 = vld [vmem:[#allocation3 + $0xa8] sm:$0xff] }
  0x1f   :  { %314 = vmatpush1.msra.mxu0 %v2768_v25  ;;  %385 = vmatpush1.msra.mxu1 %v2770_v26  ;;  %v2836_v48 = vld [vmem:[#allocation3 + $0xb8] sm:$0xff]  ;;  %v2840_v49 = vld [vmem:[#allocation3 + $0xa0] sm:$0xff]  ;;  %v2842_v50 = vld [vmem:[#allocation3 + $0xb0] sm:$0xff] }
  0x20   :  { %315 = vmatprep.subr.mxu0 %v2774_v27  ;;  %386 = vmatprep.subr.mxu1 %v2776_v28  ;;  %3946 = vst [vmem:[#allocation8_spill] sm:$0xff] %v2836_v48  ;;  %3947 = vst [vmem:[#allocation9_spill] sm:$0xff] %v2840_v49  ;;  %v2846_v51 = vld [vmem:[#allocation3 + $0x88] sm:$0xff]  ;;  %v2848_v52 = vld [vmem:[#allocation3 + $0x98] sm:$0xff] }
  0x21   :  { %316 = vmatpush1.msra.mxu0 %v2780_v29  ;;  %387 = vmatpush1.msra.mxu1 %v2782_v30  ;;  %3948 = vst [vmem:[#allocation10_spill] sm:$0xff] %v2842_v50  ;;  %3949 = vst [vmem:[#allocation11_spill] sm:$0xff] %v2846_v51  ;;  %v2852_v53 = vld [vmem:[#allocation3 + $0x80] sm:$0xff]  ;;  %v2854_v54 = vld [vmem:[#allocation3 + $0x90] sm:$0xff] }
  0x22   :  { %317 = vmatprep.subr.mxu0 %v2786_v31  ;;  %388 = vmatprep.subr.mxu1 %v2788_v32  ;;  %3950 = vst [vmem:[#allocation12_spill] sm:$0xff] %v2848_v52  ;;  %3951 = vst [vmem:[#allocation13_spill] sm:$0xff] %v2852_v53  ;;  %v2858_v55 = vld [vmem:[#allocation3 + $0x68] sm:$0xff]  ;;  %v2860_v56 = vld [vmem:[#allocation3 + $0x78] sm:$0xff] }
  0x23   :  { %318 = vmatpush1.msra.mxu0 %v2792_v33  ;;  %389 = vmatpush1.msra.mxu1 %v2794_v34  ;;  %3952 = vst [vmem:[#allocation14_spill] sm:$0xff] %v2854_v54  ;;  %3953 = vst [vmem:[#allocation15_spill] sm:$0xff] %v2858_v55  ;;  %v2864_v57 = vld [vmem:[#allocation3 + $0x60] sm:$0xff]  ;;  %v2868_v58 = vld [vmem:[#allocation3 + $0x70] sm:$0xff] }
  0x24   :  { %319 = vmatprep.subr.mxu0 %v2798_v35  ;;  %390 = vmatprep.subr.mxu1 %v2800_v36  ;;  %3954 = vst [vmem:[#allocation16_spill] sm:$0xff] %v2860_v56  ;;  %3955 = vst [vmem:[#allocation17_spill] sm:$0xff] %v2864_v57  ;;  %v40_v59 = vld [vmem:[%s3816_s0 + $0x8] sm:$0xff]  ;;  %v2877_v61 = vld [vmem:[#allocation3 + $0x58] sm:$0xff] }
  0x25   :  { %320 = vmatpush1.msra.mxu0 %v2804_v37  ;;  %391 = vmatpush1.msra.mxu1 %v2806_v38  ;;  %3956 = vst [vmem:[#allocation18_spill] sm:$0xff] %v2868_v58  ;;  %v2875_v60 = vld [vmem:[#allocation3 + $0x48] sm:$0xff]  ;;  %3958 = vst [vmem:[#allocation20_spill] sm:$0xff] %v2877_v61  ;;  %v2881_v62 = vld [vmem:[#allocation3 + $0x40] sm:$0xff] }
  0x26   :  { %321 = vmatprep.subr.mxu0 %v2810_v39  ;;  %392 = vmatprep.subr.mxu1 %v2812_v40  ;;  %3957 = vst [vmem:[#allocation19_spill] sm:$0xff] %v2875_v60  ;;  %3959 = vst [vmem:[#allocation21_spill] sm:$0xff] %v2881_v62  ;;  %v2885_v63 = vld [vmem:[#allocation3 + $0x50] sm:$0xff]  ;;  %v2887_v0 = vld [vmem:[#allocation3 + $0x28] sm:$0xff] }
  0x27   :  { %322 = vmatpush1.msra.mxu0 %v2816_v41  ;;  %393 = vmatpush1.msra.mxu1 %v2818_v42  ;;  %3960 = vst [vmem:[#allocation22_spill] sm:$0xff] %v2885_v63  ;;  %3961 = vst [vmem:[#allocation23_spill] sm:$0xff] %v2887_v0  ;;  %v2891_v2 = vld [vmem:[#allocation3 + $0x38] sm:$0xff]  ;;  %v2895_v3 = vld [vmem:[#allocation3 + $0x20] sm:$0xff] }
  0x28   :  { %323 = vmatprep.subr.mxu0 %v2822_v43  ;;  %394 = vmatprep.subr.mxu1 %v2824_v44  ;;  %3962 = vst [vmem:[#allocation24_spill] sm:$0xff] %v2891_v2  ;;  %3963 = vst [vmem:[#allocation25_spill] sm:$0xff] %v2895_v3  ;;  %v2897_v4 = vld [vmem:[#allocation3 + $0x30] sm:$0xff]  ;;  %v2901_v5 = vld [vmem:[#allocation3 + $0x8] sm:$0xff] }
  0x29   :  { %324 = vmatpush1.msra.mxu0 %v2828_v45  ;;  %395 = vmatpush1.msra.mxu1 %v2830_v46  ;;  %3964 = vst [vmem:[#allocation26_spill] sm:$0xff] %v2897_v4  ;;  %3965 = vst [vmem:[#allocation27_spill] sm:$0xff] %v2901_v5  ;;  %v2903_v6 = vld [vmem:[#allocation3 + $0x18] sm:$0xff] }
  0x2a   :  { %325 = vmatprep.subr.mxu0 %v2834_v47  ;;  %396 = vmatprep.subr.mxu1 %v2836_v48  ;;  %3966 = vst [vmem:[#allocation28_spill] sm:$0xff] %v2903_v6 }
  0x2b   :  { %326 = vmatpush1.msra.mxu0 %v2840_v49  ;;  %397 = vmatpush1.msra.mxu1 %v2842_v50 }
  0x2c   :  { %327 = vmatprep.subr.mxu0 %v2846_v51  ;;  %398 = vmatprep.subr.mxu1 %v2848_v52 }
  0x2d   :  { %328 = vmatpush1.msra.mxu0 %v2852_v53  ;;  %399 = vmatpush1.msra.mxu1 %v2854_v54 }
  0x2e   :  { %329 = vmatprep.subr.mxu0 %v2858_v55  ;;  %400 = vmatprep.subr.mxu1 %v2860_v56 }
  0x2f   :  { %133 = vmatprep.mubr.f32.mxu0 %v3825_v1  ;;  %330 = vmatpush1.msra.mxu0 %v2864_v57 }
  0x30   :  { %401 = vmatpush1.msra.mxu1 %v2868_v58  ;;  %2286 = vmatmul.mubr.msk.f32.gmra.mxu0 %vm47_vm1, %v40_v59 }
  0x31   :  { %331 = vmatprep.subr.mxu0 %v2875_v60  ;;  %402 = vmatprep.subr.mxu1 %v2877_v61  ;;  %v2907_v61 = vld [vmem:[#allocation3] sm:$0xff] }
  0x32   :  { %210 = vmatprep.mubr.f32.mxu1 %v3825_v1  ;;  %332 = vmatpush1.msra.mxu0 %v2881_v62  ;;  %3967 = vst [vmem:[#allocation29_spill] sm:$0xff] %v2907_v61  ;;  %v2911_v1 = vld [vmem:[#allocation3 + $0x10] sm:$0xff] }
  0x33   :  { %403 = vmatpush1.msra.mxu1 %v2885_v63  ;;  %333 = vmatprep.subr.mxu0 %v2887_v0  ;;  %3968 = vst [vmem:[#allocation30_spill] sm:$0xff] %v2911_v1  ;;  %v3969_v0 = vmov 0.0  }
  0x34   :  { %2290 = vmatmul.mubr.msk.f32.gmra.mxu1 %vm47_vm1, %v40_v59  ;;  %404 = vmatprep.subr.mxu1 %v2891_v2  ;;  %v3970_v59 = vld [vmem:[#allocation20_spill] sm:$0xff] }
  0x35   :  { %334 = vmatpush1.msra.mxu0 %v2895_v3  ;;  %405 = vmatpush1.msra.mxu1 %v2897_v4 }
  0x36   :  { %335 = vmatprep.subr.mxu0 %v2901_v5  ;;  %406 = vmatprep.subr.mxu1 %v2903_v6 }
  0x37   :  { %336 = vmatpush1.msra.mxu0 %v2907_v61  ;;  %369 = vmatprep.mubr.f32.mxu0 %v3969_v0 }
  0x38   :  { %407 = vmatpush1.msra.mxu1 %v2911_v1  ;;  %440 = vmatprep.mubr.f32.mxu1 %v3969_v0 }
  0x39   :  { %370 = vmatmul.mubr.f32.vlgmr.msra.gmra.mxu0 %v3969_v0  ;;  %441 = vmatmul.mubr.f32.vlgmr.msra.gmra.mxu1 %v3969_v0 }
  0x3a   :  { %482 = vmatprep.subr.mxu0 %v2716_v7  ;;  %553 = vmatprep.subr.mxu1 %v2718_v8 }
  0x3b   :  { %483 = vmatpush1.msra.mxu0 %v2720_v9  ;;  %554 = vmatpush1.msra.mxu1 %v2722_v10 }
  0x3c   :  { %484 = vmatprep.subr.mxu0 %v2726_v11  ;;  %555 = vmatprep.subr.mxu1 %v2728_v12 }
  0x3d   :  { %485 = vmatpush1.msra.mxu0 %v2732_v13  ;;  %556 = vmatpush1.msra.mxu1 %v2734_v14 }
  0x3e   :  { %486 = vmatprep.subr.mxu0 %v2738_v15  ;;  %557 = vmatprep.subr.mxu1 %v2740_v16 }
  0x3f   :  { %487 = vmatpush1.msra.mxu0 %v2744_v17  ;;  %558 = vmatpush1.msra.mxu1 %v2746_v18 }
  0x40   :  { %488 = vmatprep.subr.mxu0 %v2750_v19  ;;  %559 = vmatprep.subr.mxu1 %v2752_v20 }
  0x41   :  { %489 = vmatpush1.msra.mxu0 %v2756_v21  ;;  %560 = vmatpush1.msra.mxu1 %v2758_v22 }
  0x42   :  { %490 = vmatprep.subr.mxu0 %v2762_v23  ;;  %561 = vmatprep.subr.mxu1 %v2764_v24 }
  0x43   :  { %491 = vmatpush1.msra.mxu0 %v2768_v25  ;;  %562 = vmatpush1.msra.mxu1 %v2770_v26 }
  0x44   :  { %492 = vmatprep.subr.mxu0 %v2774_v27  ;;  %563 = vmatprep.subr.mxu1 %v2776_v28 }
  0x45   :  { %493 = vmatpush1.msra.mxu0 %v2780_v29  ;;  %564 = vmatpush1.msra.mxu1 %v2782_v30 }
  0x46   :  { %494 = vmatprep.subr.mxu0 %v2786_v31  ;;  %565 = vmatprep.subr.mxu1 %v2788_v32 }
  0x47   :  { %495 = vmatpush1.msra.mxu0 %v2792_v33  ;;  %566 = vmatpush1.msra.mxu1 %v2794_v34 }
  0x48   :  { %496 = vmatprep.subr.mxu0 %v2798_v35  ;;  %567 = vmatprep.subr.mxu1 %v2800_v36 }
  0x49   :  { %497 = vmatpush1.msra.mxu0 %v2804_v37  ;;  %568 = vmatpush1.msra.mxu1 %v2806_v38 }
  0x4a   :  { %498 = vmatprep.subr.mxu0 %v2810_v39  ;;  %569 = vmatprep.subr.mxu1 %v2812_v40 }
  0x4b   :  { %499 = vmatpush1.msra.mxu0 %v2816_v41  ;;  %570 = vmatpush1.msra.mxu1 %v2818_v42 }
  0x4c   :  { %500 = vmatprep.subr.mxu0 %v2822_v43  ;;  %571 = vmatprep.subr.mxu1 %v2824_v44 }
  0x4d   :  { %501 = vmatpush1.msra.mxu0 %v2828_v45  ;;  %572 = vmatpush1.msra.mxu1 %v2830_v46 }
  0x4e   :  { %502 = vmatprep.subr.mxu0 %v2834_v47  ;;  %573 = vmatprep.subr.mxu1 %v2836_v48 }
  0x4f   :  { %503 = vmatpush1.msra.mxu0 %v2840_v49  ;;  %574 = vmatpush1.msra.mxu1 %v2842_v50 }
  0x50   :  { %504 = vmatprep.subr.mxu0 %v2846_v51  ;;  %575 = vmatprep.subr.mxu1 %v2848_v52  ;;  %v3971_v52 = vld [vmem:[#allocation23_spill] sm:$0xff] }
  0x51   :  { %505 = vmatpush1.msra.mxu0 %v2852_v53  ;;  %576 = vmatpush1.msra.mxu1 %v2854_v54 }
  0x52   :  { %506 = vmatprep.subr.mxu0 %v2858_v55  ;;  %577 = vmatprep.subr.mxu1 %v2860_v56 }
  0x53   :  { %507 = vmatpush1.msra.mxu0 %v2864_v57  ;;  %578 = vmatpush1.msra.mxu1 %v2868_v58 }
  0x54   :  { %508 = vmatprep.subr.mxu0 %v2875_v60  ;;  %579 = vmatprep.subr.mxu1 %v3970_v59 }
  0x55   :  { %509 = vmatpush1.msra.mxu0 %v2881_v62  ;;  %580 = vmatpush1.msra.mxu1 %v2885_v63 }
  0x56   :  { %510 = vmatprep.subr.mxu0 %v3971_v52  ;;  %581 = vmatprep.subr.mxu1 %v2891_v2  ;;  %v282_v2 = vlaneseq }
  0x57   :  { %511 = vmatpush1.msra.mxu0 %v2895_v3  ;;  %582 = vmatpush1.msra.mxu1 %v2897_v4 }
  0x58   :  { %512 = vmatprep.subr.mxu0 %v2901_v5  ;;  %583 = vmatprep.subr.mxu1 %v2903_v6  ;;  %v286_v4 = vshrl.u32 %v282_v2, 7 }
  0x59   :  { %513 = vmatpush1.msra.mxu0 %v2907_v61  ;;  %546 = vmatprep.mubr.f32.mxu0 %v3969_v0 }
  0x5a   :  { %584 = vmatpush1.msra.mxu1 %v2911_v1  ;;  %617 = vmatprep.mubr.f32.mxu1 %v3969_v0  ;;  %v287_v6 = vsub.s32 0, %v286_v4  ;;  %v281_v1 = vld [vmem:[%s3819_s3] sm:$0xf]  ;;  %v291_v0 = vsub.s32 1, %v286_v4  ;;  %v295_v57 = vsub.s32 2, %v286_v4 }
  0x5b   :  { %670 = vmatprep.subr.mxu0 %v2716_v7  ;;  %741 = vmatprep.subr.mxu1 %v2718_v8 }
  0x5c   :  { %v3002_v7 = vrot.slane %v281_v1, %v287_v6  ;;  %v3008_v59 = vrot.slane %v281_v1, %v291_v0  ;;  %v3016_v51 = vrot.slane %v281_v1, %v295_v57 }
  0x5e   :  { %3975 = vst [vmem:[#allocation34_spill] sm:$0xff] %v3002_v7  ;;  %3978 = vst [vmem:[#allocation37_spill] sm:$0xff] %v3008_v59 }
  0xd5   :  { %v2989_v3 = vpop.f32.mrf.mxu0 }
  0xd6   :  { %3972 = vst [vmem:[#allocation31_spill] sm:$0xff] %v2989_v3  ;;  %v2993_v5 = vpop.f32.mrf.mxu1 }
  0xd7   :  { %v2991_v52 = vpop.f32.mrf.mxu0 }
  0xd8   :  { %3973 = vst [vmem:[#allocation32_spill] sm:$0xff] %v2991_v52  ;;  %v3000_v63 = vpop.f32.mrf.mxu1 }
  0xf0   :  { %v2995_v61 = vpop.f32.mrf.mxu0 }
  0xf1   :  { %3974 = vst [vmem:[#allocation33_spill] sm:$0xff] %v2995_v61 }
  0xf2   :  { %v3004_v8 = vpop.f32.mrf.mxu0 }
  0xf3   :  { %3976 = vst [vmem:[#allocation35_spill] sm:$0xff] %v3004_v8  ;;  %v299_v8 = vsub.s32 3, %v286_v4 }
  0xf4   :  { %v3006_v62 = vpop.f32.mrf.mxu1 }
  0xf5   :  { %3977 = vst [vmem:[#allocation36_spill] sm:$0xff] %v3006_v62 }
  0xf6   :  { %v3011_v56 = vpop.f32.mrf.mxu1 }
  0xf7   :  { %3979 = vst [vmem:[#allocation38_spill] sm:$0xff] %v3011_v56 }
  0xf9   :  { %v371_v60 = vpop.f32.mrf.mxu0  ;;  %v442_v62 = vpop.f32.mrf.mxu1 }
  0xfa   :  { %v372_v58 = vadd.f32 %v371_v60, %v3002_v7  ;;  %v443_v60 = vadd.f32 %v442_v62, %v3016_v51  ;;  %v3019_v7 = vrot.slane %v281_v1, %v299_v8  ;;  %v3024_v1 = vand.u32 127, %v282_v2  ;;  %v3981_v2 = vld [vmem:[#allocation10_spill] sm:$0xff] }
  0xfb   :  { %v373_v61 = vpop.f32.mrf.mxu0  ;;  %v444_v50 = vpop.f32.mrf.mxu1 }
  0xfc   :  { %v447_v55 = vadd.f32 %v372_v58, %v2989_v3  ;;  %v374_v54 = vadd.f32 %v373_v61, %v3008_v59  ;;  %v449_v56 = vadd.f32 %v443_v60, %v2993_v5  ;;  %v445_v58 = vadd.f32 %v444_v50, %v3019_v7  ;;  %3980 = vst [vmem:[#allocation39_spill] sm:$0xff] %v3024_v1 }
  0xfd   :  { %vm476_vm2 = vcmp.lt.s32.totalorder %v3024_v1, 32  ;;  %vm664_vm3 = vcmp.lt.s32.totalorder %v3024_v1, 64  ;;  %vm848_vm4 = vcmp.lt.s32.totalorder %v3024_v1, 96  ;;  %v3442_v1 = vld [vmem:[#allocation3 + $0x38] sm:$0xff] }
  0xfe   :  { %v2291_v53 = vmul.f32 -1.442695, %v447_v55  ;;  %v448_v6 = vadd.f32 %v374_v54, %v2991_v52  ;;  %v2293_v61 = vmul.f32 -1.442695, %v449_v56  ;;  %v450_v54 = vadd.f32 %v445_v58, %v3000_v63 }
 0x100   :  { %2334 = vpow2.f32 %v2291_v53  ;;  %v2292_v0 = vmul.f32 -1.442695, %v448_v6 }
 0x102   :  { %2336 = vpow2.f32 %v2292_v0 }
 0x103   :  { %2338 = vpow2.f32 %v2293_v61 }
 0x10d   :  { %v2335_v55 = vpop.eup %2334 }
 0x10e   :  { %v460_v57 = vadd.f32 1.0, %v2335_v55 }
 0x10f   :  { %v2337_v52 = vpop.eup %2336 }
 0x110   :  { %2340 = vrcp.f32 %v460_v57  ;;  %v461_v53 = vadd.f32 1.0, %v2337_v52  ;;  %v2339_v4 = vpop.eup %2338  ;;  %v3982_v57 = vld [vmem:[#allocation11_spill] sm:$0xff] }
 0x111   :  { %2342 = vtanh.f32 %v450_v54  ;;  %v462_v0 = vadd.f32 1.0, %v2339_v4  ;;  %v3984_v4 = vld [vmem:[#allocation13_spill] sm:$0xff] }
 0x112   :  { %2344 = vrcp.f32 %v461_v53  ;;  %v3983_v53 = vld [vmem:[#allocation12_spill] sm:$0xff] }
 0x113   :  { %2346 = vrcp.f32 %v462_v0  ;;  %v3988_v0 = vld [vmem:[#allocation17_spill] sm:$0xff] }
 0x11d   :  { %v2341_v62 = vpop.eup %2340 }
 0x11e   :  { %v2343_v8 = vpop.eup %2342 }
 0x11f   :  { %v2345_v6 = vpop.eup %2344  ;;  %v471_v50 = vmul.f32 %v2343_v8, %v2341_v62  ;;  %v3985_v62 = vld [vmem:[#allocation14_spill] sm:$0xff]  ;;  %v3986_v8 = vld [vmem:[#allocation15_spill] sm:$0xff] }
 0x120   :  { %v470_v60 = vmul.f32 0.0, %v2345_v6  ;;  %v2347_v61 = vpop.eup %2346  ;;  %v3987_v6 = vld [vmem:[#allocation16_spill] sm:$0xff] }
 0x122   :  { %v472_v56 = vadd.f32 %v471_v50, %v470_v60  ;;  %v3989_v60 = vld [vmem:[#allocation18_spill] sm:$0xff]  ;;  %v3990_v50 = vld [vmem:[#allocation19_spill] sm:$0xff] }
 0x124   :  { %2348 = vtanh.f32 %v472_v56  ;;  %v3027_v58 = vsel %vm476_vm2, %v472_v56, 0.0  ;;  %v3991_v56 = vld [vmem:[#allocation20_spill] sm:$0xff] }
 0x131   :  { %v2349_v52 = vpop.eup %2348 }
 0x132   :  { %v474_v55 = vmul.f32 %v2349_v52, %v2347_v61  ;;  %v3992_v61 = vld [vmem:[#allocation21_spill] sm:$0xff]  ;;  %v3993_v52 = vld [vmem:[#allocation22_spill] sm:$0xff] }
 0x134   :  { %2294 = vmatmul.mubr.msk.f32.vlgmr.msra.gmra.mxu0 %vm476_vm2, %v474_v55  ;;  %2295 = vmatmul.mubr.msk.f32.vlgmr.msra.gmra.mxu1 %vm476_vm2, %v474_v55  ;;  %v3029_v54 = vsel %vm476_vm2, %v474_v55, 0.0  ;;  %v3994_v55 = vld [vmem:[#allocation23_spill] sm:$0xff] }
 0x135   :  { %671 = vmatpush1.msra.mxu0 %v2720_v9  ;;  %742 = vmatpush1.msra.mxu1 %v2722_v10 }
 0x136   :  { %672 = vmatprep.subr.mxu0 %v2726_v11  ;;  %743 = vmatprep.subr.mxu1 %v2728_v12 }
 0x137   :  { %673 = vmatpush1.msra.mxu0 %v2732_v13  ;;  %744 = vmatpush1.msra.mxu1 %v2734_v14 }
 0x138   :  { %674 = vmatprep.subr.mxu0 %v2738_v15  ;;  %745 = vmatprep.subr.mxu1 %v2740_v16 }
 0x139   :  { %675 = vmatpush1.msra.mxu0 %v2744_v17  ;;  %746 = vmatpush1.msra.mxu1 %v2746_v18 }
 0x13a   :  { %676 = vmatprep.subr.mxu0 %v2750_v19  ;;  %747 = vmatprep.subr.mxu1 %v2752_v20 }
 0x13b   :  { %677 = vmatpush1.msra.mxu0 %v2756_v21  ;;  %748 = vmatpush1.msra.mxu1 %v2758_v22 }
 0x13c   :  { %678 = vmatprep.subr.mxu0 %v2762_v23  ;;  %749 = vmatprep.subr.mxu1 %v2764_v24 }
 0x13d   :  { %679 = vmatpush1.msra.mxu0 %v2768_v25  ;;  %750 = vmatpush1.msra.mxu1 %v2770_v26 }
 0x13e   :  { %680 = vmatprep.subr.mxu0 %v2774_v27  ;;  %751 = vmatprep.subr.mxu1 %v2776_v28 }
 0x13f   :  { %681 = vmatpush1.msra.mxu0 %v2780_v29  ;;  %752 = vmatpush1.msra.mxu1 %v2782_v30 }
 0x140   :  { %682 = vmatprep.subr.mxu0 %v2786_v31  ;;  %753 = vmatprep.subr.mxu1 %v2788_v32 }
 0x141   :  { %683 = vmatpush1.msra.mxu0 %v2792_v33  ;;  %754 = vmatpush1.msra.mxu1 %v2794_v34 }
 0x142   :  { %684 = vmatprep.subr.mxu0 %v2798_v35  ;;  %755 = vmatprep.subr.mxu1 %v2800_v36 }
 0x143   :  { %685 = vmatpush1.msra.mxu0 %v2804_v37  ;;  %756 = vmatpush1.msra.mxu1 %v2806_v38 }
 0x144   :  { %686 = vmatprep.subr.mxu0 %v2810_v39  ;;  %757 = vmatprep.subr.mxu1 %v2812_v40 }
 0x145   :  { %687 = vmatpush1.msra.mxu0 %v2816_v41  ;;  %758 = vmatpush1.msra.mxu1 %v2818_v42 }
 0x146   :  { %688 = vmatprep.subr.mxu0 %v2822_v43  ;;  %759 = vmatprep.subr.mxu1 %v2824_v44 }
 0x147   :  { %689 = vmatpush1.msra.mxu0 %v2828_v45  ;;  %760 = vmatpush1.msra.mxu1 %v2830_v46 }
 0x148   :  { %690 = vmatprep.subr.mxu0 %v2834_v47  ;;  %761 = vmatprep.subr.mxu1 %v2836_v48 }
 0x149   :  { %691 = vmatpush1.msra.mxu0 %v2840_v49  ;;  %762 = vmatpush1.msra.mxu1 %v3981_v2 }
 0x14a   :  { %692 = vmatprep.subr.mxu0 %v3982_v57  ;;  %763 = vmatprep.subr.mxu1 %v3983_v53 }
 0x14b   :  { %693 = vmatpush1.msra.mxu0 %v3984_v4  ;;  %764 = vmatpush1.msra.mxu1 %v3985_v62  ;;  %v3995_v4 = vld [vmem:[#allocation24_spill] sm:$0xff]  ;;  %v3996_v62 = vld [vmem:[#allocation25_spill] sm:$0xff] }
 0x14c   :  { %694 = vmatprep.subr.mxu0 %v3986_v8  ;;  %765 = vmatprep.subr.mxu1 %v3987_v6  ;;  %v3997_v8 = vld [vmem:[#allocation26_spill] sm:$0xff]  ;;  %v3998_v6 = vld [vmem:[#allocation27_spill] sm:$0xff] }
 0x14d   :  { %695 = vmatpush1.msra.mxu0 %v3988_v0  ;;  %766 = vmatpush1.msra.mxu1 %v3989_v60  ;;  %v3999_v0 = vld [vmem:[#allocation28_spill] sm:$0xff]  ;;  %v4000_v60 = vld [vmem:[#allocation29_spill] sm:$0xff] }
 0x14e   :  { %696 = vmatprep.subr.mxu0 %v3990_v50  ;;  %767 = vmatprep.subr.mxu1 %v3991_v56  ;;  %v4001_v50 = vmov 0.0   ;;  %v4002_v56 = vld [vmem:[#allocation30_spill] sm:$0xff] }
 0x14f   :  { %697 = vmatpush1.msra.mxu0 %v3992_v61  ;;  %768 = vmatpush1.msra.mxu1 %v3993_v52  ;;  %v4003_v52 = vld [vmem:[#allocation6_spill] sm:$0xff] }
 0x150   :  { %698 = vmatprep.subr.mxu0 %v3994_v55  ;;  %769 = vmatprep.subr.mxu1 %v3995_v4  ;;  %v4004_v55 = vld [vmem:[#allocation7_spill] sm:$0xff] }
 0x151   :  { %699 = vmatpush1.msra.mxu0 %v3996_v62  ;;  %770 = vmatpush1.msra.mxu1 %v3997_v8  ;;  %v4005_v62 = vld [vmem:[#allocation34_spill] sm:$0xff]  ;;  %v628_v8 = vrot.slane %v2989_v3, 2 }
 0x152   :  { %700 = vmatprep.subr.mxu0 %v3998_v6  ;;  %771 = vmatprep.subr.mxu1 %v3999_v0 }
 0x153   :  { %701 = vmatpush1.msra.mxu0 %v4000_v60  ;;  %734 = vmatprep.mubr.f32.mxu0 %v4001_v50  ;;  %v4006_v60 = vld [vmem:[#allocation32_spill] sm:$0xff] }
 0x154   :  { %772 = vmatpush1.msra.mxu1 %v4002_v56  ;;  %805 = vmatprep.mubr.f32.mxu1 %v4001_v50  ;;  %v629_v57 = vrot.slane %v4006_v60, 2 }
 0x155   :  { %854 = vmatprep.subr.mxu0 %v4003_v52  ;;  %925 = vmatprep.subr.mxu1 %v4004_v55  ;;  %v630_v55 = vrot.slane %v2993_v5, 2 }
 0x1f4   :  { %v548_v4 = vpop.f32.mrf.mxu0  ;;  %v619_v56 = vpop.f32.mrf.mxu1 }
 0x1f5   :  { %v549_v61 = vadd.f32 %v548_v4, %v4005_v62  ;;  %v620_v52 = vadd.f32 %v619_v56, %v3016_v51 }
 0x1f6   :  { %v550_v6 = vpop.f32.mrf.mxu0  ;;  %v621_v48 = vpop.f32.mrf.mxu1 }
 0x1f7   :  { %v636_v53 = vadd.f32 %v628_v8, %v549_v61  ;;  %v551_v0 = vadd.f32 %v550_v6, %v3008_v59  ;;  %v638_v4 = vadd.f32 %v630_v55, %v620_v52  ;;  %v622_v3 = vadd.f32 %v621_v48, %v3019_v7 }
 0x1f8   :  { %v631_v8 = vrot.slane %v3000_v63, 2 }
 0x1f9   :  { %v2296_v2 = vmul.f32 -1.442695, %v636_v53  ;;  %v637_v49 = vadd.f32 %v629_v57, %v551_v0  ;;  %v2298_v61 = vmul.f32 -1.442695, %v638_v4 }
 0x1fa   :  { %v639_v6 = vadd.f32 %v631_v8, %v622_v3 }
 0x1fb   :  { %2350 = vpow2.f32 %v2296_v2  ;;  %v2297_v50 = vmul.f32 -1.442695, %v637_v49 }
 0x1fd   :  { %2352 = vpow2.f32 %v2297_v50 }
 0x1fe   :  { %2354 = vpow2.f32 %v2298_v61  ;;  %v4009_v61 = vld [vmem:[#allocation10_spill] sm:$0xff] }
 0x1ff   :  { %2356 = vtanh.f32 %v639_v6  ;;  %v4010_v6 = vld [vmem:[#allocation11_spill] sm:$0xff] }
 0x208   :  { %v2351_v59 = vpop.eup %2350 }
 0x209   :  { %v649_v60 = vadd.f32 1.0, %v2351_v59 }
 0x20a   :  { %v2353_v57 = vpop.eup %2352 }
 0x20b   :  { %2358 = vrcp.f32 %v649_v60  ;;  %v650_v49 = vadd.f32 1.0, %v2353_v57  ;;  %v2355_v2 = vpop.eup %2354  ;;  %v4011_v57 = vld [vmem:[#allocation12_spill] sm:$0xff] }
 0x20c   :  { %v2357_v53 = vpop.eup %2356  ;;  %v651_v52 = vadd.f32 1.0, %v2355_v2  ;;  %v4013_v2 = vld [vmem:[#allocation14_spill] sm:$0xff] }
 0x20d   :  { %2360 = vrcp.f32 %v650_v49  ;;  %v4012_v49 = vld [vmem:[#allocation13_spill] sm:$0xff] }
 0x20e   :  { %2362 = vrcp.f32 %v651_v52  ;;  %v4018_v52 = vld [vmem:[#allocation19_spill] sm:$0xff] }
 0x218   :  { %v2359_v0 = vpop.eup %2358 }
 0x219   :  { %v660_v50 = vmul.f32 %v2359_v0, %v2357_v53  ;;  %v4014_v53 = vld [vmem:[#allocation15_spill] sm:$0xff]  ;;  %v4015_v0 = vld [vmem:[#allocation16_spill] sm:$0xff] }
 0x21a   :  { %v2361_v56 = vpop.eup %2360 }
 0x21b   :  { %v659_v48 = vmul.f32 %v2361_v56, %v3027_v58  ;;  %v2363_v59 = vpop.eup %2362  ;;  %v4017_v56 = vld [vmem:[#allocation18_spill] sm:$0xff] }
 0x21d   :  { %v661_v55 = vadd.f32 %v660_v50, %v659_v48  ;;  %v4016_v50 = vld [vmem:[#allocation17_spill] sm:$0xff]  ;;  %v4019_v48 = vld [vmem:[#allocation20_spill] sm:$0xff] }
 0x21f   :  { %2364 = vtanh.f32 %v661_v55  ;;  %v3108_v3 = vsel %vm664_vm3, %v661_v55, %v3027_v58  ;;  %v4007_v58 = vld [vmem:[#allocation8_spill] sm:$0xff]  ;;  %v4020_v55 = vld [vmem:[#allocation21_spill] sm:$0xff] }
 0x22c   :  { %v2365_v60 = vpop.eup %2364 }
 0x22d   :  { %v663_v4 = vmul.f32 %v2365_v60, %v2363_v59  ;;  %v4021_v59 = vld [vmem:[#allocation22_spill] sm:$0xff]  ;;  %v4022_v60 = vld [vmem:[#allocation23_spill] sm:$0xff] }
 0x22f   :  { %v3111_v8 = vsel %vm664_vm3, %v663_v4, %v3029_v54  ;;  %v4008_v54 = vld [vmem:[#allocation9_spill] sm:$0xff]  ;;  %v4023_v4 = vld [vmem:[#allocation24_spill] sm:$0xff] }
 0x230   :  { %735 = vmatmul.mubr.f32.vlgmr.msra.gmra.mxu0 %v3111_v8  ;;  %806 = vmatmul.mubr.f32.vlgmr.msra.gmra.mxu1 %v3111_v8 }
 0x231   :  { %855 = vmatpush1.msra.mxu0 %v2720_v9  ;;  %926 = vmatpush1.msra.mxu1 %v2722_v10 }
 0x232   :  { %856 = vmatprep.subr.mxu0 %v2726_v11  ;;  %927 = vmatprep.subr.mxu1 %v2728_v12 }
 0x233   :  { %857 = vmatpush1.msra.mxu0 %v2732_v13  ;;  %928 = vmatpush1.msra.mxu1 %v2734_v14 }
 0x234   :  { %858 = vmatprep.subr.mxu0 %v2738_v15  ;;  %929 = vmatprep.subr.mxu1 %v2740_v16 }
 0x235   :  { %859 = vmatpush1.msra.mxu0 %v2744_v17  ;;  %930 = vmatpush1.msra.mxu1 %v2746_v18 }
 0x236   :  { %860 = vmatprep.subr.mxu0 %v2750_v19  ;;  %931 = vmatprep.subr.mxu1 %v2752_v20 }
 0x237   :  { %861 = vmatpush1.msra.mxu0 %v2756_v21  ;;  %932 = vmatpush1.msra.mxu1 %v2758_v22 }
 0x238   :  { %862 = vmatprep.subr.mxu0 %v2762_v23  ;;  %933 = vmatprep.subr.mxu1 %v2764_v24 }
 0x239   :  { %863 = vmatpush1.msra.mxu0 %v2768_v25  ;;  %934 = vmatpush1.msra.mxu1 %v2770_v26 }
 0x23a   :  { %864 = vmatprep.subr.mxu0 %v2774_v27  ;;  %935 = vmatprep.subr.mxu1 %v2776_v28 }
 0x23b   :  { %865 = vmatpush1.msra.mxu0 %v2780_v29  ;;  %936 = vmatpush1.msra.mxu1 %v2782_v30 }
 0x23c   :  { %866 = vmatprep.subr.mxu0 %v2786_v31  ;;  %937 = vmatprep.subr.mxu1 %v2788_v32 }
 0x23d   :  { %867 = vmatpush1.msra.mxu0 %v2792_v33  ;;  %938 = vmatpush1.msra.mxu1 %v2794_v34 }
 0x23e   :  { %868 = vmatprep.subr.mxu0 %v2798_v35  ;;  %939 = vmatprep.subr.mxu1 %v2800_v36 }
 0x23f   :  { %869 = vmatpush1.msra.mxu0 %v2804_v37  ;;  %940 = vmatpush1.msra.mxu1 %v2806_v38 }
 0x240   :  { %870 = vmatprep.subr.mxu0 %v2810_v39  ;;  %941 = vmatprep.subr.mxu1 %v2812_v40 }
 0x241   :  { %871 = vmatpush1.msra.mxu0 %v2816_v41  ;;  %942 = vmatpush1.msra.mxu1 %v2818_v42 }
 0x242   :  { %872 = vmatprep.subr.mxu0 %v2822_v43  ;;  %943 = vmatprep.subr.mxu1 %v2824_v44 }
 0x243   :  { %873 = vmatpush1.msra.mxu0 %v2828_v45  ;;  %944 = vmatpush1.msra.mxu1 %v2830_v46 }
 0x244   :  { %874 = vmatprep.subr.mxu0 %v2834_v47  ;;  %945 = vmatprep.subr.mxu1 %v4007_v58 }
 0x245   :  { %875 = vmatpush1.msra.mxu0 %v4008_v54  ;;  %946 = vmatpush1.msra.mxu1 %v4009_v61 }
 0x246   :  { %876 = vmatprep.subr.mxu0 %v4010_v6  ;;  %947 = vmatprep.subr.mxu1 %v4011_v57 }
 0x247   :  { %877 = vmatpush1.msra.mxu0 %v4012_v49  ;;  %948 = vmatpush1.msra.mxu1 %v4013_v2  ;;  %v4024_v2 = vld [vmem:[#allocation25_spill] sm:$0xff] }
 0x248   :  { %878 = vmatprep.subr.mxu0 %v4014_v53  ;;  %949 = vmatprep.subr.mxu1 %v4015_v0  ;;  %v4025_v53 = vld [vmem:[#allocation26_spill] sm:$0xff]  ;;  %v4026_v0 = vld [vmem:[#allocation27_spill] sm:$0xff] }
 0x249   :  { %879 = vmatpush1.msra.mxu0 %v4016_v50  ;;  %950 = vmatpush1.msra.mxu1 %v4017_v56  ;;  %v4027_v50 = vld [vmem:[#allocation28_spill] sm:$0xff]  ;;  %v4028_v56 = vld [vmem:[#allocation29_spill] sm:$0xff] }
 0x24a   :  { %880 = vmatprep.subr.mxu0 %v4018_v52  ;;  %951 = vmatprep.subr.mxu1 %v4019_v48  ;;  %v4029_v52 = vmov 0.0   ;;  %v4030_v48 = vld [vmem:[#allocation30_spill] sm:$0xff] }
 0x24b   :  { %881 = vmatpush1.msra.mxu0 %v4020_v55  ;;  %952 = vmatpush1.msra.mxu1 %v4021_v59  ;;  %v4031_v59 = vld [vmem:[#allocation6_spill] sm:$0xff] }
 0x24c   :  { %882 = vmatprep.subr.mxu0 %v4022_v60  ;;  %953 = vmatprep.subr.mxu1 %v4023_v4  ;;  %v4032_v60 = vld [vmem:[#allocation7_spill] sm:$0xff] }
 0x24d   :  { %883 = vmatpush1.msra.mxu0 %v4024_v2  ;;  %954 = vmatpush1.msra.mxu1 %v4025_v53  ;;  %v4033_v53 = vld [vmem:[#allocation31_spill] sm:$0xff] }
 0x24e   :  { %884 = vmatprep.subr.mxu0 %v4026_v0  ;;  %955 = vmatprep.subr.mxu1 %v4027_v50  ;;  %v812_v55 = vrot.slane %v4033_v53, 4  ;;  %v4034_v50 = vld [vmem:[#allocation37_spill] sm:$0xff] }
 0x24f   :  { %885 = vmatpush1.msra.mxu0 %v4028_v56  ;;  %918 = vmatprep.mubr.f32.mxu0 %v4029_v52  ;;  %v4035_v56 = vld [vmem:[#allocation32_spill] sm:$0xff] }
 0x250   :  { %956 = vmatpush1.msra.mxu1 %v4030_v48  ;;  %989 = vmatprep.mubr.f32.mxu1 %v4029_v52  ;;  %v813_v6 = vrot.slane %v4035_v56, 4 }
 0x251   :  { %1032 = vmatprep.subr.mxu0 %v4031_v59  ;;  %1103 = vmatprep.subr.mxu1 %v4032_v60  ;;  %v814_v60 = vrot.slane %v2993_v5, 4 }
 0x2f0   :  { %v736_v4 = vpop.f32.mrf.mxu0  ;;  %v807_v48 = vpop.f32.mrf.mxu1 }
 0x2f1   :  { %v737_v2 = vadd.f32 %v736_v4, %v4005_v62  ;;  %v808_v59 = vadd.f32 %v807_v48, %v3016_v51 }
 0x2f2   :  { %v738_v0 = vpop.f32.mrf.mxu0  ;;  %v809_v58 = vpop.f32.mrf.mxu1 }
 0x2f3   :  { %v820_v49 = vadd.f32 %v812_v55, %v737_v2  ;;  %v739_v57 = vadd.f32 %v738_v0, %v4034_v50  ;;  %v822_v4 = vadd.f32 %v814_v60, %v808_v59  ;;  %v810_v53 = vadd.f32 %v809_v58, %v3019_v7 }
 0x2f4   :  { %v815_v2 = vrot.slane %v3000_v63, 4 }
 0x2f5   :  { %v2299_v61 = vmul.f32 -1.442695, %v820_v49  ;;  %v821_v54 = vadd.f32 %v813_v6, %v739_v57  ;;  %v2301_v55 = vmul.f32 -1.442695, %v822_v4 }
 0x2f6   :  { %v823_v0 = vadd.f32 %v815_v2, %v810_v53 }
 0x2f7   :  { %2366 = vpow2.f32 %v2299_v61  ;;  %v2300_v52 = vmul.f32 -1.442695, %v821_v54 }
 0x2f9   :  { %2368 = vpow2.f32 %v2300_v52 }
 0x2fa   :  { %2370 = vpow2.f32 %v2301_v55  ;;  %v998_v55 = vrot.slane %v2993_v5, 6 }
 0x2fb   :  { %2372 = vtanh.f32 %v823_v0 }
 0x304   :  { %v2367_v50 = vpop.eup %2366 }
 0x305   :  { %v833_v56 = vadd.f32 1.0, %v2367_v50 }
 0x306   :  { %v2369_v6 = vpop.eup %2368 }
 0x307   :  { %2374 = vrcp.f32 %v833_v56  ;;  %v834_v54 = vadd.f32 1.0, %v2369_v6  ;;  %v2371_v61 = vpop.eup %2370 }
 0x308   :  { %v2373_v57 = vpop.eup %2372  ;;  %v835_v59 = vadd.f32 1.0, %v2371_v61  ;;  %v999_v61 = vrot.slane %v3000_v63, 6 }
 0x309   :  { %2376 = vrcp.f32 %v834_v54 }
 0x30a   :  { %2378 = vrcp.f32 %v835_v59 }
 0x314   :  { %v2375_v49 = vpop.eup %2374 }
 0x315   :  { %v844_v52 = vmul.f32 %v2375_v49, %v2373_v57 }
 0x316   :  { %v2377_v48 = vpop.eup %2376 }
 0x317   :  { %v843_v58 = vmul.f32 %v2377_v48, %v3108_v3  ;;  %v2379_v50 = vpop.eup %2378 }
 0x319   :  { %v845_v60 = vadd.f32 %v844_v52, %v843_v58 }
 0x31b   :  { %2380 = vtanh.f32 %v845_v60  ;;  %v3192_v53 = vsel %vm848_vm4, %v845_v60, %v3108_v3 }
 0x328   :  { %v2381_v56 = vpop.eup %2380 }
 0x329   :  { %v847_v4 = vmul.f32 %v2381_v56, %v2379_v50 }
 0x32b   :  { %v853_v2 = vsel %vm848_vm4, %v847_v4, %v3111_v8 }
 0x32c   :  { %919 = vmatmul.mubr.f32.vlgmr.msra.gmra.mxu0 %v853_v2  ;;  %990 = vmatmul.mubr.f32.vlgmr.msra.gmra.mxu1 %v853_v2 }
 0x32d   :  { %1033 = vmatpush1.msra.mxu0 %v2720_v9  ;;  %1104 = vmatpush1.msra.mxu1 %v2722_v10  ;;  %v4036_v9 = vld [vmem:[#allocation8_spill] sm:$0xff]  ;;  %v4037_v10 = vld [vmem:[#allocation9_spill] sm:$0xff] }
 0x32e   :  { %1034 = vmatprep.subr.mxu0 %v2726_v11  ;;  %1105 = vmatprep.subr.mxu1 %v2728_v12  ;;  %v4038_v11 = vld [vmem:[#allocation10_spill] sm:$0xff]  ;;  %v4039_v12 = vld [vmem:[#allocation11_spill] sm:$0xff] }
 0x32f   :  { %1035 = vmatpush1.msra.mxu0 %v2732_v13  ;;  %1106 = vmatpush1.msra.mxu1 %v2734_v14  ;;  %v4040_v13 = vld [vmem:[#allocation12_spill] sm:$0xff]  ;;  %v4041_v14 = vld [vmem:[#allocation13_spill] sm:$0xff] }
 0x330   :  { %1036 = vmatprep.subr.mxu0 %v2738_v15  ;;  %1107 = vmatprep.subr.mxu1 %v2740_v16  ;;  %v4042_v15 = vld [vmem:[#allocation14_spill] sm:$0xff]  ;;  %v4043_v16 = vld [vmem:[#allocation15_spill] sm:$0xff] }
 0x331   :  { %1037 = vmatpush1.msra.mxu0 %v2744_v17  ;;  %1108 = vmatpush1.msra.mxu1 %v2746_v18  ;;  %v4044_v17 = vld [vmem:[#allocation16_spill] sm:$0xff]  ;;  %v4045_v18 = vld [vmem:[#allocation17_spill] sm:$0xff] }
 0x332   :  { %1038 = vmatprep.subr.mxu0 %v2750_v19  ;;  %1109 = vmatprep.subr.mxu1 %v2752_v20  ;;  %v4046_v19 = vld [vmem:[#allocation18_spill] sm:$0xff]  ;;  %v4047_v20 = vld [vmem:[#allocation19_spill] sm:$0xff] }
 0x333   :  { %1039 = vmatpush1.msra.mxu0 %v2756_v21  ;;  %1110 = vmatpush1.msra.mxu1 %v2758_v22  ;;  %v4048_v21 = vld [vmem:[#allocation20_spill] sm:$0xff]  ;;  %v4049_v22 = vld [vmem:[#allocation21_spill] sm:$0xff] }
 0x334   :  { %1040 = vmatprep.subr.mxu0 %v2762_v23  ;;  %1111 = vmatprep.subr.mxu1 %v2764_v24  ;;  %v4050_v23 = vld [vmem:[#allocation22_spill] sm:$0xff]  ;;  %v4051_v24 = vld [vmem:[#allocation23_spill] sm:$0xff] }
 0x335   :  { %1041 = vmatpush1.msra.mxu0 %v2768_v25  ;;  %1112 = vmatpush1.msra.mxu1 %v2770_v26  ;;  %v4052_v25 = vld [vmem:[#allocation24_spill] sm:$0xff]  ;;  %v4053_v26 = vld [vmem:[#allocation25_spill] sm:$0xff]  ;;  %4079 = vst [vmem:[#allocation22_spill] sm:$0xff] %v3442_v1 }
 0x336   :  { %1042 = vmatprep.subr.mxu0 %v2774_v27  ;;  %1113 = vmatprep.subr.mxu1 %v2776_v28  ;;  %v4054_v27 = vld [vmem:[#allocation26_spill] sm:$0xff]  ;;  %v4055_v28 = vld [vmem:[#allocation27_spill] sm:$0xff] }
 0x337   :  { %1043 = vmatpush1.msra.mxu0 %v2780_v29  ;;  %1114 = vmatpush1.msra.mxu1 %v2782_v30  ;;  %v4056_v29 = vld [vmem:[#allocation28_spill] sm:$0xff]  ;;  %v4057_v30 = vld [vmem:[#allocation29_spill] sm:$0xff] }
 0x338   :  { %1044 = vmatprep.subr.mxu0 %v2786_v31  ;;  %1115 = vmatprep.subr.mxu1 %v2788_v32  ;;  %v4058_v31 = vmov 0.0   ;;  %v4059_v32 = vld [vmem:[#allocation30_spill] sm:$0xff] }
 0x339   :  { %1045 = vmatpush1.msra.mxu0 %v2792_v33  ;;  %1116 = vmatpush1.msra.mxu1 %v2794_v34  ;;  %v3259_v33 = vld [vmem:[#allocation3 + $0x1e8] sm:$0xff]  ;;  %v3262_v34 = vld [vmem:[#allocation3 + $0x1f8] sm:$0xff] }
 0x33a   :  { %1046 = vmatprep.subr.mxu0 %v2798_v35  ;;  %1117 = vmatprep.subr.mxu1 %v2800_v36  ;;  %4060 = vst [vmem:[#allocation6_spill] sm:$0xff] %v3259_v33  ;;  %4061 = vst [vmem:[#allocation7_spill] sm:$0xff] %v3262_v34 }
 0x33b   :  { %1047 = vmatpush1.msra.mxu0 %v2804_v37  ;;  %1118 = vmatpush1.msra.mxu1 %v2806_v38  ;;  %v4062_v37 = vld [vmem:[#allocation31_spill] sm:$0xff] }
 0x33c   :  { %1048 = vmatprep.subr.mxu0 %v2810_v39  ;;  %1119 = vmatprep.subr.mxu1 %v2812_v40  ;;  %v996_v38 = vrot.slane %v4062_v37, 6  ;;  %v3343_v37 = vld [vmem:[#allocation3 + $0x128] sm:$0xff] }
 0x33d   :  { %1049 = vmatpush1.msra.mxu0 %v2816_v41  ;;  %1120 = vmatpush1.msra.mxu1 %v2818_v42  ;;  %v4063_v41 = vld [vmem:[#allocation37_spill] sm:$0xff] }
 0x33e   :  { %1050 = vmatprep.subr.mxu0 %v2822_v43  ;;  %1121 = vmatprep.subr.mxu1 %v2824_v44  ;;  %v4064_v43 = vld [vmem:[#allocation32_spill] sm:$0xff] }
 0x33f   :  { %1051 = vmatpush1.msra.mxu0 %v2828_v45  ;;  %1122 = vmatpush1.msra.mxu1 %v2830_v46  ;;  %v997_v44 = vrot.slane %v4064_v43, 6  ;;  %v3358_v43 = vld [vmem:[#allocation3 + $0x118] sm:$0xff] }
 0x340   :  { %1052 = vmatprep.subr.mxu0 %v2834_v47  ;;  %1123 = vmatprep.subr.mxu1 %v4036_v9 }
 0x341   :  { %1053 = vmatpush1.msra.mxu0 %v4037_v10  ;;  %1124 = vmatpush1.msra.mxu1 %v4038_v11 }
 0x342   :  { %1054 = vmatprep.subr.mxu0 %v4039_v12  ;;  %1125 = vmatprep.subr.mxu1 %v4040_v13  ;;  %v3277_v13 = vld [vmem:[#allocation3 + $0x1e0] sm:$0xff] }
 0x343   :  { %1055 = vmatpush1.msra.mxu0 %v4041_v14  ;;  %1126 = vmatpush1.msra.mxu1 %v4042_v15  ;;  %v3280_v14 = vld [vmem:[#allocation3 + $0x1f0] sm:$0xff]  ;;  %v3283_v15 = vld [vmem:[#allocation3 + $0x1c8] sm:$0xff] }
 0x344   :  { %1056 = vmatprep.subr.mxu0 %v4043_v16  ;;  %1127 = vmatprep.subr.mxu1 %v4044_v17  ;;  %v3289_v16 = vld [vmem:[#allocation3 + $0x1c0] sm:$0xff]  ;;  %v3292_v17 = vld [vmem:[#allocation3 + $0x1d0] sm:$0xff] }
 0x345   :  { %1057 = vmatpush1.msra.mxu0 %v4045_v18  ;;  %1128 = vmatpush1.msra.mxu1 %v4046_v19  ;;  %v3295_v18 = vld [vmem:[#allocation3 + $0x1a8] sm:$0xff]  ;;  %v3298_v19 = vld [vmem:[#allocation3 + $0x1b8] sm:$0xff] }
 0x346   :  { %1058 = vmatprep.subr.mxu0 %v4047_v20  ;;  %1129 = vmatprep.subr.mxu1 %v4048_v21  ;;  %v3301_v20 = vld [vmem:[#allocation3 + $0x1a0] sm:$0xff]  ;;  %v3304_v21 = vld [vmem:[#allocation3 + $0x1b0] sm:$0xff] }
 0x347   :  { %1059 = vmatpush1.msra.mxu0 %v4049_v22  ;;  %1130 = vmatpush1.msra.mxu1 %v4050_v23  ;;  %v3307_v22 = vld [vmem:[#allocation3 + $0x188] sm:$0xff]  ;;  %v3310_v23 = vld [vmem:[#allocation3 + $0x198] sm:$0xff] }
 0x348   :  { %1060 = vmatprep.subr.mxu0 %v4051_v24  ;;  %1131 = vmatprep.subr.mxu1 %v4052_v25  ;;  %v3313_v24 = vld [vmem:[#allocation3 + $0x180] sm:$0xff]  ;;  %v3316_v25 = vld [vmem:[#allocation3 + $0x190] sm:$0xff] }
 0x349   :  { %1061 = vmatpush1.msra.mxu0 %v4053_v26  ;;  %1132 = vmatpush1.msra.mxu1 %v4054_v27  ;;  %v3319_v26 = vld [vmem:[#allocation3 + $0x168] sm:$0xff]  ;;  %v3322_v27 = vld [vmem:[#allocation3 + $0x178] sm:$0xff] }
 0x34a   :  { %1062 = vmatprep.subr.mxu0 %v4055_v28  ;;  %1133 = vmatprep.subr.mxu1 %v4056_v29  ;;  %v3325_v28 = vld [vmem:[#allocation3 + $0x160] sm:$0xff]  ;;  %v3328_v29 = vld [vmem:[#allocation3 + $0x170] sm:$0xff] }
 0x34b   :  { %1063 = vmatpush1.msra.mxu0 %v4057_v30  ;;  %1096 = vmatprep.mubr.f32.mxu0 %v4058_v31  ;;  %v3331_v30 = vld [vmem:[#allocation3 + $0x148] sm:$0xff] }
 0x34c   :  { %1134 = vmatpush1.msra.mxu1 %v4059_v32  ;;  %1167 = vmatprep.mubr.f32.mxu1 %v4058_v31  ;;  %v3334_v32 = vld [vmem:[#allocation3 + $0x158] sm:$0xff] }
 0x34d   :  { %1202 = vmatprep.subr.mxu0 %v3259_v33  ;;  %1273 = vmatprep.subr.mxu1 %v3262_v34 }
 0x3ec   :  { %v920_v35 = vpop.f32.mrf.mxu0  ;;  %v991_v47 = vpop.f32.mrf.mxu1 }
 0x3ed   :  { %v921_v36 = vadd.f32 %v920_v35, %v4005_v62  ;;  %v992_v8 = vadd.f32 %v991_v47, %v3016_v51  ;;  %v3337_v35 = vld [vmem:[#allocation3 + $0x140] sm:$0xff]  ;;  %v3370_v47 = vld [vmem:[#allocation3 + $0xf8] sm:$0xff] }
 0x3ee   :  { %v922_v39 = vpop.f32.mrf.mxu0  ;;  %v993_v0 = vpop.f32.mrf.mxu1 }
 0x3ef   :  { %v1004_v40 = vadd.f32 %v996_v38, %v921_v36  ;;  %v923_v42 = vadd.f32 %v922_v39, %v4063_v41  ;;  %v1006_v6 = vadd.f32 %v998_v55, %v992_v8  ;;  %v994_v54 = vadd.f32 %v993_v0, %v3019_v7  ;;  %v3340_v36 = vld [vmem:[#allocation3 + $0x150] sm:$0xff]  ;;  %v3346_v38 = vld [vmem:[#allocation3 + $0x138] sm:$0xff]  ;;  %v3349_v39 = vld [vmem:[#allocation3 + $0x120] sm:$0xff] }
 0x3f0   :  { %v3376_v8 = vld [vmem:[#allocation3 + $0xf0] sm:$0xff]  ;;  %v3379_v55 = vld [vmem:[#allocation3 + $0xc8] sm:$0xff]  ;;  %v3382_v0 = vld [vmem:[#allocation3 + $0xd8] sm:$0xff] }
 0x3f1   :  { %v2302_v45 = vmul.f32 -1.442695, %v1004_v40  ;;  %v1005_v46 = vadd.f32 %v997_v44, %v923_v42  ;;  %v2304_v57 = vmul.f32 -1.442695, %v1006_v6  ;;  %v1007_v49 = vadd.f32 %v999_v61, %v994_v54  ;;  %v3352_v40 = vld [vmem:[#allocation3 + $0x130] sm:$0xff]  ;;  %v3355_v42 = vld [vmem:[#allocation3 + $0x108] sm:$0xff] }
 0x3f2   :  { %v3361_v44 = vld [vmem:[#allocation3 + $0x100] sm:$0xff]  ;;  %v3388_v54 = vld [vmem:[#allocation3 + $0xd0] sm:$0xff]  ;;  %v3391_v61 = vld [vmem:[#allocation3 + $0xa8] sm:$0xff] }
 0x3f3   :  { %2382 = vpow2.f32 %v2302_v45  ;;  %v2303_v3 = vmul.f32 -1.442695, %v1005_v46  ;;  %v3364_v45 = vld [vmem:[#allocation3 + $0x110] sm:$0xff]  ;;  %v3367_v46 = vld [vmem:[#allocation3 + $0xe8] sm:$0xff]  ;;  %v3385_v6 = vld [vmem:[#allocation3 + $0xc0] sm:$0xff] }
 0x3f5   :  { %2384 = vpow2.f32 %v2303_v3  ;;  %v3373_v3 = vld [vmem:[#allocation3 + $0xe0] sm:$0xff] }
 0x3f6   :  { %2386 = vpow2.f32 %v2304_v57  ;;  %v3394_v57 = vld [vmem:[#allocation3 + $0xb8] sm:$0xff] }
 0x3f7   :  { %2388 = vtanh.f32 %v1007_v49  ;;  %v3397_v49 = vld [vmem:[#allocation3 + $0xa0] sm:$0xff] }
 0x400   :  { %v2383_v52 = vpop.eup %2382 }
 0x401   :  { %v1017_v48 = vadd.f32 1.0, %v2383_v52  ;;  %v3400_v52 = vld [vmem:[#allocation3 + $0xb0] sm:$0xff] }
 0x402   :  { %v2385_v59 = vpop.eup %2384  ;;  %4065 = vst [vmem:[#allocation8_spill] sm:$0xff] %v3400_v52 }
 0x403   :  { %2390 = vrcp.f32 %v1017_v48  ;;  %v1018_v58 = vadd.f32 1.0, %v2385_v59  ;;  %v2387_v60 = vpop.eup %2386  ;;  %v3403_v48 = vld [vmem:[#allocation3 + $0x88] sm:$0xff]  ;;  %v3406_v59 = vld [vmem:[#allocation3 + $0x98] sm:$0xff] }
 0x404   :  { %v2389_v50 = vpop.eup %2388  ;;  %v1019_v2 = vadd.f32 1.0, %v2387_v60  ;;  %4066 = vst [vmem:[#allocation9_spill] sm:$0xff] %v3403_v48  ;;  %4067 = vst [vmem:[#allocation10_spill] sm:$0xff] %v3406_v59  ;;  %v3412_v60 = vld [vmem:[#allocation3 + $0x90] sm:$0xff] }
 0x405   :  { %2392 = vrcp.f32 %v1018_v58  ;;  %v3409_v58 = vld [vmem:[#allocation3 + $0x80] sm:$0xff]  ;;  %4069 = vst [vmem:[#allocation12_spill] sm:$0xff] %v3412_v60 }
 0x406   :  { %2394 = vrcp.f32 %v1019_v2  ;;  %4068 = vst [vmem:[#allocation11_spill] sm:$0xff] %v3409_v58  ;;  %v3427_v2 = vld [vmem:[#allocation3 + $0x48] sm:$0xff] }
 0x407   :  { %4074 = vst [vmem:[#allocation17_spill] sm:$0xff] %v3427_v2 }
 0x410   :  { %v2391_v56 = vpop.eup %2390 }
 0x411   :  { %v1028_v5 = vmul.f32 %v2391_v56, %v2389_v50  ;;  %v3415_v50 = vld [vmem:[#allocation3 + $0x68] sm:$0xff]  ;;  %v3418_v56 = vld [vmem:[#allocation3 + $0x78] sm:$0xff] }
 0x412   :  { %v2393_v4 = vpop.eup %2392  ;;  %4070 = vst [vmem:[#allocation13_spill] sm:$0xff] %v3415_v50  ;;  %4071 = vst [vmem:[#allocation14_spill] sm:$0xff] %v3418_v56 }
 0x413   :  { %v1027_v9 = vmul.f32 %v2393_v4, %v3192_v53  ;;  %v2395_v63 = vpop.eup %2394  ;;  %v3286_v53 = vld [vmem:[#allocation3 + $0x1d8] sm:$0xff]  ;;  %v3424_v4 = vld [vmem:[#allocation3 + $0x70] sm:$0xff] }
 0x414   :  { %4073 = vst [vmem:[#allocation16_spill] sm:$0xff] %v3424_v4 }
 0x415   :  { %v3274_v10 = vadd.f32 %v1028_v5, %v1027_v9  ;;  %v3421_v5 = vld [vmem:[#allocation3 + $0x60] sm:$0xff]  ;;  %v3430_v9 = vld [vmem:[#allocation3 + $0x58] sm:$0xff] }
 0x416   :  { %4072 = vst [vmem:[#allocation15_spill] sm:$0xff] %v3421_v5  ;;  %4075 = vst [vmem:[#allocation18_spill] sm:$0xff] %v3430_v9 }
 0x417   :  { %2396 = vtanh.f32 %v3274_v10 }
 0x424   :  { %v2397_v11 = vpop.eup %2396 }
 0x425   :  { %v1031_v12 = vmul.f32 %v2397_v11, %v2395_v63  ;;  %v3433_v63 = vld [vmem:[#allocation3 + $0x40] sm:$0xff]  ;;  %v3436_v11 = vld [vmem:[#allocation3 + $0x50] sm:$0xff] }
 0x426   :  { %4076 = vst [vmem:[#allocation19_spill] sm:$0xff] %v3433_v63  ;;  %4077 = vst [vmem:[#allocation20_spill] sm:$0xff] %v3436_v11 }
 0x427   :  { %1097 = vmatmul.mubr.f32.vlgmr.msra.gmra.mxu0 %v1031_v12  ;;  %1168 = vmatmul.mubr.f32.vlgmr.msra.gmra.mxu1 %v1031_v12  ;;  %v3439_v12 = vld [vmem:[#allocation3 + $0x28] sm:$0xff] }
 0x428   :  { %1203 = vmatpush1.msra.mxu0 %v3277_v13  ;;  %1274 = vmatpush1.msra.mxu1 %v3280_v14  ;;  %4078 = vst [vmem:[#allocation21_spill] sm:$0xff] %v3439_v12 }
 0x429   :  { %1204 = vmatprep.subr.mxu0 %v3283_v15  ;;  %1275 = vmatprep.subr.mxu1 %v3286_v53 }
 0x42a   :  { %1205 = vmatpush1.msra.mxu0 %v3289_v16  ;;  %1276 = vmatpush1.msra.mxu1 %v3292_v17 }
 0x42b   :  { %1206 = vmatprep.subr.mxu0 %v3295_v18  ;;  %1277 = vmatprep.subr.mxu1 %v3298_v19 }
 0x42c   :  { %1207 = vmatpush1.msra.mxu0 %v3301_v20  ;;  %1278 = vmatpush1.msra.mxu1 %v3304_v21 }
 0x42d   :  { %1208 = vmatprep.subr.mxu0 %v3307_v22  ;;  %1279 = vmatprep.subr.mxu1 %v3310_v23 }
 0x42e   :  { %1209 = vmatpush1.msra.mxu0 %v3313_v24  ;;  %1280 = vmatpush1.msra.mxu1 %v3316_v25 }
 0x42f   :  { %1210 = vmatprep.subr.mxu0 %v3319_v26  ;;  %1281 = vmatprep.subr.mxu1 %v3322_v27 }
 0x430   :  { %1211 = vmatpush1.msra.mxu0 %v3325_v28  ;;  %1282 = vmatpush1.msra.mxu1 %v3328_v29 }
 0x431   :  { %1212 = vmatprep.subr.mxu0 %v3331_v30  ;;  %1283 = vmatprep.subr.mxu1 %v3334_v32 }
 0x432   :  { %1213 = vmatpush1.msra.mxu0 %v3337_v35  ;;  %1284 = vmatpush1.msra.mxu1 %v3340_v36 }
 0x433   :  { %1214 = vmatprep.subr.mxu0 %v3343_v37  ;;  %1285 = vmatprep.subr.mxu1 %v3346_v38 }
 0x434   :  { %1215 = vmatpush1.msra.mxu0 %v3349_v39  ;;  %1286 = vmatpush1.msra.mxu1 %v3352_v40 }
 0x435   :  { %1216 = vmatprep.subr.mxu0 %v3355_v42  ;;  %1287 = vmatprep.subr.mxu1 %v3358_v43 }
 0x436   :  { %1217 = vmatpush1.msra.mxu0 %v3361_v44  ;;  %1288 = vmatpush1.msra.mxu1 %v3364_v45 }
 0x437   :  { %1218 = vmatprep.subr.mxu0 %v3367_v46  ;;  %1289 = vmatprep.subr.mxu1 %v3370_v47 }
 0x438   :  { %1219 = vmatpush1.msra.mxu0 %v3373_v3  ;;  %1290 = vmatpush1.msra.mxu1 %v3376_v8 }
 0x439   :  { %1220 = vmatprep.subr.mxu0 %v3379_v55  ;;  %1291 = vmatprep.subr.mxu1 %v3382_v0 }
 0x43a   :  { %1221 = vmatpush1.msra.mxu0 %v3385_v6  ;;  %1292 = vmatpush1.msra.mxu1 %v3388_v54 }
 0x43b   :  { %1222 = vmatprep.subr.mxu0 %v3391_v61  ;;  %1293 = vmatprep.subr.mxu1 %v3394_v57 }
 0x43c   :  { %1223 = vmatpush1.msra.mxu0 %v3397_v49  ;;  %1294 = vmatpush1.msra.mxu1 %v3400_v52 }
 0x43d   :  { %1224 = vmatprep.subr.mxu0 %v3403_v48  ;;  %1295 = vmatprep.subr.mxu1 %v3406_v59  ;;  %v4089_v48 = vld [vmem:[#allocation38_spill] sm:$0xff] }
 0x43e   :  { %1225 = vmatpush1.msra.mxu0 %v3409_v58  ;;  %1296 = vmatpush1.msra.mxu1 %v3412_v60  ;;  %v4088_v58 = vld [vmem:[#allocation36_spill] sm:$0xff] }
 0x43f   :  { %1226 = vmatprep.subr.mxu0 %v3415_v50  ;;  %1297 = vmatprep.subr.mxu1 %v3418_v56  ;;  %v4087_v56 = vld [vmem:[#allocation35_spill] sm:$0xff] }
 0x440   :  { %1227 = vmatpush1.msra.mxu0 %v3421_v5  ;;  %1298 = vmatpush1.msra.mxu1 %v3424_v4 }
 0x441   :  { %1228 = vmatprep.subr.mxu0 %v3427_v2  ;;  %1299 = vmatprep.subr.mxu1 %v3430_v9  ;;  %v3445_v2 = vld [vmem:[#allocation3 + $0x20] sm:$0xff]  ;;  %v3448_v9 = vld [vmem:[#allocation3 + $0x30] sm:$0xff] }
 0x442   :  { %1229 = vmatpush1.msra.mxu0 %v3433_v63  ;;  %1300 = vmatpush1.msra.mxu1 %v3436_v11  ;;  %4080 = vst [vmem:[#allocation23_spill] sm:$0xff] %v3445_v2  ;;  %4081 = vst [vmem:[#allocation24_spill] sm:$0xff] %v3448_v9  ;;  %v3451_v63 = vld [vmem:[#allocation3 + $0x8] sm:$0xff]  ;;  %v3454_v11 = vld [vmem:[#allocation3 + $0x18] sm:$0xff] }
 0x443   :  { %1230 = vmatprep.subr.mxu0 %v3439_v12  ;;  %1301 = vmatprep.subr.mxu1 %v3442_v1  ;;  %4082 = vst [vmem:[#allocation25_spill] sm:$0xff] %v3451_v63  ;;  %4083 = vst [vmem:[#allocation26_spill] sm:$0xff] %v3454_v11  ;;  %v3457_v12 = vld [vmem:[#allocation3] sm:$0xff]  ;;  %v3461_v1 = vld [vmem:[#allocation3 + $0x10] sm:$0xff] }
 0x444   :  { %1231 = vmatpush1.msra.mxu0 %v3445_v2  ;;  %1302 = vmatpush1.msra.mxu1 %v3448_v9  ;;  %4084 = vst [vmem:[#allocation27_spill] sm:$0xff] %v3457_v12  ;;  %4085 = vst [vmem:[#allocation28_spill] sm:$0xff] %v3461_v1  ;;  %v4086_v2 = vld [vmem:[#allocation33_spill] sm:$0xff] }
 0x445   :  { %1232 = vmatprep.subr.mxu0 %v3451_v63  ;;  %1303 = vmatprep.subr.mxu1 %v3454_v11 }
 0x446   :  { %1233 = vmatpush1.msra.mxu0 %v3457_v12  ;;  %1266 = vmatprep.mubr.f32.mxu0 %v4058_v31 }
 0x447   :  { %1304 = vmatpush1.msra.mxu1 %v3461_v1  ;;  %1337 = vmatprep.mubr.f32.mxu1 %v4058_v31 }
 0x448   :  { %1384 = vmatprep.subr.mxu0 %v3259_v33  ;;  %1455 = vmatprep.subr.mxu1 %v3262_v34 }
 0x4e7   :  { %v1098_v63 = vpop.f32.mrf.mxu0  ;;  %v1169_v60 = vpop.f32.mrf.mxu1 }
 0x4e8   :  { %v1099_v9 = vadd.f32 %v1098_v63, %v4005_v62  ;;  %v1170_v31 = vadd.f32 %v1169_v60, %v3016_v51 }
 0x4e9   :  { %v1100_v11 = vpop.f32.mrf.mxu0  ;;  %v1171_v33 = vpop.f32.mrf.mxu1 }
 0x4ea   :  { %v1174_v4 = vadd.f32 %v1099_v9, %v4086_v2  ;;  %v1101_v12 = vadd.f32 %v1100_v11, %v4063_v41  ;;  %v1176_v34 = vadd.f32 %v1170_v31, %v4088_v58  ;;  %v1172_v59 = vadd.f32 %v1171_v33, %v3019_v7 }
 0x4ec   :  { %v2305_v5 = vmul.f32 -1.442695, %v1174_v4  ;;  %v1175_v50 = vadd.f32 %v1101_v12, %v4087_v56  ;;  %v2307_v63 = vmul.f32 -1.442695, %v1176_v34  ;;  %v1177_v9 = vadd.f32 %v1172_v59, %v4089_v48 }
 0x4ee   :  { %2398 = vpow2.f32 %v2305_v5  ;;  %v2306_v1 = vmul.f32 -1.442695, %v1175_v50 }
 0x4f0   :  { %2400 = vpow2.f32 %v2306_v1 }
 0x4f1   :  { %2402 = vpow2.f32 %v2307_v63  ;;  %v4093_v63 = vld [vmem:[#allocation12_spill] sm:$0xff] }
 0x4fb   :  { %v2399_v62 = vpop.eup %2398 }
 0x4fc   :  { %v1187_v2 = vadd.f32 1.0, %v2399_v62 }
 0x4fd   :  { %v2401_v11 = vpop.eup %2400 }
 0x4fe   :  { %2404 = vrcp.f32 %v1187_v2  ;;  %v1188_v4 = vadd.f32 1.0, %v2401_v11  ;;  %v2403_v50 = vpop.eup %2402  ;;  %v4092_v2 = vld [vmem:[#allocation11_spill] sm:$0xff]  ;;  %v4095_v11 = vld [vmem:[#allocation14_spill] sm:$0xff] }
 0x4ff   :  { %2406 = vtanh.f32 %v1177_v9  ;;  %v1189_v12 = vadd.f32 1.0, %v2403_v50  ;;  %v4094_v9 = vld [vmem:[#allocation13_spill] sm:$0xff]  ;;  %v4097_v50 = vld [vmem:[#allocation16_spill] sm:$0xff] }
 0x500   :  { %2408 = vrcp.f32 %v1188_v4  ;;  %v4096_v4 = vld [vmem:[#allocation15_spill] sm:$0xff] }
 0x501   :  { %2410 = vrcp.f32 %v1189_v12  ;;  %v4101_v12 = vld [vmem:[#allocation20_spill] sm:$0xff] }
 0x50b   :  { %v2405_v1 = vpop.eup %2404 }
 0x50c   :  { %v2407_v5 = vpop.eup %2406 }
 0x50d   :  { %v2409_v60 = vpop.eup %2408  ;;  %v1198_v58 = vmul.f32 %v2407_v5, %v2405_v1  ;;  %v4098_v1 = vld [vmem:[#allocation17_spill] sm:$0xff]  ;;  %v4099_v5 = vld [vmem:[#allocation18_spill] sm:$0xff] }
 0x50e   :  { %v1197_v31 = vmul.f32 %v2409_v60, %v3274_v10  ;;  %v2411_v62 = vpop.eup %2410  ;;  %v4090_v10 = vld [vmem:[#allocation9_spill] sm:$0xff]  ;;  %v4100_v60 = vld [vmem:[#allocation19_spill] sm:$0xff] }
 0x510   :  { %v3476_v33 = vadd.f32 %v1198_v58, %v1197_v31  ;;  %v4091_v58 = vld [vmem:[#allocation10_spill] sm:$0xff]  ;;  %v4102_v31 = vld [vmem:[#allocation21_spill] sm:$0xff] }
 0x512   :  { %2412 = vtanh.f32 %v3476_v33 }
 0x51f   :  { %v2413_v34 = vpop.eup %2412 }
 0x520   :  { %v1201_v59 = vmul.f32 %v2413_v34, %v2411_v62  ;;  %v4103_v62 = vld [vmem:[#allocation22_spill] sm:$0xff]  ;;  %v4104_v34 = vld [vmem:[#allocation23_spill] sm:$0xff] }
 0x522   :  { %1267 = vmatmul.mubr.f32.vlgmr.msra.gmra.mxu0 %v1201_v59  ;;  %1338 = vmatmul.mubr.f32.vlgmr.msra.gmra.mxu1 %v1201_v59  ;;  %v4105_v59 = vld [vmem:[#allocation24_spill] sm:$0xff] }
 0x523   :  { %1385 = vmatpush1.msra.mxu0 %v3277_v13  ;;  %1456 = vmatpush1.msra.mxu1 %v3280_v14 }
 0x524   :  { %1386 = vmatprep.subr.mxu0 %v3283_v15  ;;  %1457 = vmatprep.subr.mxu1 %v3286_v53 }
 0x525   :  { %1387 = vmatpush1.msra.mxu0 %v3289_v16  ;;  %1458 = vmatpush1.msra.mxu1 %v3292_v17 }
 0x526   :  { %1388 = vmatprep.subr.mxu0 %v3295_v18  ;;  %1459 = vmatprep.subr.mxu1 %v3298_v19 }
 0x527   :  { %1389 = vmatpush1.msra.mxu0 %v3301_v20  ;;  %1460 = vmatpush1.msra.mxu1 %v3304_v21 }
 0x528   :  { %1390 = vmatprep.subr.mxu0 %v3307_v22  ;;  %1461 = vmatprep.subr.mxu1 %v3310_v23 }
 0x529   :  { %1391 = vmatpush1.msra.mxu0 %v3313_v24  ;;  %1462 = vmatpush1.msra.mxu1 %v3316_v25 }
 0x52a   :  { %1392 = vmatprep.subr.mxu0 %v3319_v26  ;;  %1463 = vmatprep.subr.mxu1 %v3322_v27 }
 0x52b   :  { %1393 = vmatpush1.msra.mxu0 %v3325_v28  ;;  %1464 = vmatpush1.msra.mxu1 %v3328_v29 }
 0x52c   :  { %1394 = vmatprep.subr.mxu0 %v3331_v30  ;;  %1465 = vmatprep.subr.mxu1 %v3334_v32 }
 0x52d   :  { %1395 = vmatpush1.msra.mxu0 %v3337_v35  ;;  %1466 = vmatpush1.msra.mxu1 %v3340_v36 }
 0x52e   :  { %1396 = vmatprep.subr.mxu0 %v3343_v37  ;;  %1467 = vmatprep.subr.mxu1 %v3346_v38 }
 0x52f   :  { %1397 = vmatpush1.msra.mxu0 %v3349_v39  ;;  %1468 = vmatpush1.msra.mxu1 %v3352_v40 }
 0x530   :  { %1398 = vmatprep.subr.mxu0 %v3355_v42  ;;  %1469 = vmatprep.subr.mxu1 %v3358_v43 }
 0x531   :  { %1399 = vmatpush1.msra.mxu0 %v3361_v44  ;;  %1470 = vmatpush1.msra.mxu1 %v3364_v45 }
 0x532   :  { %1400 = vmatprep.subr.mxu0 %v3367_v46  ;;  %1471 = vmatprep.subr.mxu1 %v3370_v47 }
 0x533   :  { %1401 = vmatpush1.msra.mxu0 %v3373_v3  ;;  %1472 = vmatpush1.msra.mxu1 %v3376_v8 }
 0x534   :  { %1402 = vmatprep.subr.mxu0 %v3379_v55  ;;  %1473 = vmatprep.subr.mxu1 %v3382_v0 }
 0x535   :  { %1403 = vmatpush1.msra.mxu0 %v3385_v6  ;;  %1474 = vmatpush1.msra.mxu1 %v3388_v54 }
 0x536   :  { %1404 = vmatprep.subr.mxu0 %v3391_v61  ;;  %1475 = vmatprep.subr.mxu1 %v3394_v57 }
 0x537   :  { %1405 = vmatpush1.msra.mxu0 %v3397_v49  ;;  %1476 = vmatpush1.msra.mxu1 %v3400_v52 }
 0x538   :  { %1406 = vmatprep.subr.mxu0 %v4090_v10  ;;  %1477 = vmatprep.subr.mxu1 %v4091_v58 }
 0x539   :  { %1407 = vmatpush1.msra.mxu0 %v4092_v2  ;;  %1478 = vmatpush1.msra.mxu1 %v4093_v63 }
 0x53a   :  { %1408 = vmatprep.subr.mxu0 %v4094_v9  ;;  %1479 = vmatprep.subr.mxu1 %v4095_v11  ;;  %v4106_v11 = vld [vmem:[#allocation25_spill] sm:$0xff] }
 0x53b   :  { %1409 = vmatpush1.msra.mxu0 %v4096_v4  ;;  %1480 = vmatpush1.msra.mxu1 %v4097_v50  ;;  %v4107_v4 = vld [vmem:[#allocation26_spill] sm:$0xff]  ;;  %v4108_v50 = vld [vmem:[#allocation27_spill] sm:$0xff] }
 0x53c   :  { %1410 = vmatprep.subr.mxu0 %v4098_v1  ;;  %1481 = vmatprep.subr.mxu1 %v4099_v5  ;;  %v4109_v1 = vmov 0.0   ;;  %v4110_v5 = vld [vmem:[#allocation28_spill] sm:$0xff] }
 0x53d   :  { %1411 = vmatpush1.msra.mxu0 %v4100_v60  ;;  %1482 = vmatpush1.msra.mxu1 %v4101_v12  ;;  %v4111_v12 = vld [vmem:[#allocation6_spill] sm:$0xff] }
 0x53e   :  { %1412 = vmatprep.subr.mxu0 %v4102_v31  ;;  %1483 = vmatprep.subr.mxu1 %v4103_v62  ;;  %v4112_v31 = vld [vmem:[#allocation7_spill] sm:$0xff] }
 0x53f   :  { %1413 = vmatpush1.msra.mxu0 %v4104_v34  ;;  %1484 = vmatpush1.msra.mxu1 %v4105_v59  ;;  %v4113_v34 = vld [vmem:[#allocation34_spill] sm:$0xff]  ;;  %v4114_v59 = vld [vmem:[#allocation33_spill] sm:$0xff] }
 0x540   :  { %1414 = vmatprep.subr.mxu0 %v4106_v11  ;;  %1485 = vmatprep.subr.mxu1 %v4107_v4  ;;  %v1348_v9 = vrot.slane %v4114_v59, 2 }
 0x541   :  { %1415 = vmatpush1.msra.mxu0 %v4108_v50  ;;  %1448 = vmatprep.mubr.f32.mxu0 %v4109_v1  ;;  %v1349_v50 = vrot.slane %v4087_v56, 2 }
 0x542   :  { %1486 = vmatpush1.msra.mxu1 %v4110_v5  ;;  %1519 = vmatprep.mubr.f32.mxu1 %v4109_v1 }
 0x543   :  { %1562 = vmatprep.subr.mxu0 %v4111_v12  ;;  %1633 = vmatprep.subr.mxu1 %v4112_v31  ;;  %v4115_v31 = vld [vmem:[#allocation36_spill] sm:$0xff] }
 0x544   :  { %v1350_v10 = vrot.slane %v4115_v31, 2 }
 0x5e2   :  { %v1268_v62 = vpop.f32.mrf.mxu0  ;;  %v1339_v5 = vpop.f32.mrf.mxu1 }
 0x5e3   :  { %v1269_v60 = vadd.f32 %v1268_v62, %v4113_v34  ;;  %v1340_v12 = vadd.f32 %v1339_v5, %v3016_v51 }
 0x5e4   :  { %v1270_v11 = vpop.f32.mrf.mxu0  ;;  %v1341_v52 = vpop.f32.mrf.mxu1 }
 0x5e5   :  { %v1356_v63 = vadd.f32 %v1348_v9, %v1269_v60  ;;  %v1271_v4 = vadd.f32 %v1270_v11, %v4063_v41  ;;  %v1358_v62 = vadd.f32 %v1350_v10, %v1340_v12  ;;  %v1342_v59 = vadd.f32 %v1341_v52, %v3019_v7 }
 0x5e6   :  { %v1351_v9 = vrot.slane %v4089_v48, 2 }
 0x5e7   :  { %v2308_v2 = vmul.f32 -1.442695, %v1356_v63  ;;  %v1357_v58 = vadd.f32 %v1349_v50, %v1271_v4  ;;  %v2310_v34 = vmul.f32 -1.442695, %v1358_v62 }
 0x5e8   :  { %v1359_v60 = vadd.f32 %v1351_v9, %v1342_v59  ;;  %v4118_v9 = vld [vmem:[#allocation10_spill] sm:$0xff] }
 0x5e9   :  { %2414 = vpow2.f32 %v2308_v2  ;;  %v2309_v1 = vmul.f32 -1.442695, %v1357_v58 }
 0x5eb   :  { %2416 = vpow2.f32 %v2309_v1 }
 0x5ec   :  { %2418 = vpow2.f32 %v2310_v34 }
 0x5f6   :  { %v2415_v11 = vpop.eup %2414 }
 0x5f7   :  { %v1369_v56 = vadd.f32 1.0, %v2415_v11  ;;  %v4119_v11 = vld [vmem:[#allocation11_spill] sm:$0xff] }
 0x5f8   :  { %v2417_v63 = vpop.eup %2416 }
 0x5f9   :  { %2420 = vrcp.f32 %v1369_v56  ;;  %v1370_v2 = vadd.f32 1.0, %v2417_v63  ;;  %v2419_v58 = vpop.eup %2418  ;;  %v4116_v56 = vld [vmem:[#allocation8_spill] sm:$0xff]  ;;  %v4121_v63 = vld [vmem:[#allocation13_spill] sm:$0xff] }
 0x5fa   :  { %2422 = vtanh.f32 %v1359_v60  ;;  %v1371_v5 = vadd.f32 1.0, %v2419_v58  ;;  %v4120_v60 = vld [vmem:[#allocation12_spill] sm:$0xff]  ;;  %v4123_v58 = vld [vmem:[#allocation15_spill] sm:$0xff] }
 0x5fb   :  { %2424 = vrcp.f32 %v1370_v2  ;;  %v4122_v2 = vld [vmem:[#allocation14_spill] sm:$0xff] }
 0x5fc   :  { %2426 = vrcp.f32 %v1371_v5  ;;  %v4127_v5 = vld [vmem:[#allocation19_spill] sm:$0xff] }
 0x606   :  { %v2421_v4 = vpop.eup %2420 }
 0x607   :  { %v2423_v50 = vpop.eup %2422 }
 0x608   :  { %v2425_v1 = vpop.eup %2424  ;;  %v1380_v52 = vmul.f32 %v2423_v50, %v2421_v4  ;;  %v4124_v4 = vld [vmem:[#allocation16_spill] sm:$0xff]  ;;  %v4125_v50 = vld [vmem:[#allocation17_spill] sm:$0xff] }
 0x609   :  { %v1379_v10 = vmul.f32 %v2425_v1, %v3476_v33  ;;  %v2427_v59 = vpop.eup %2426  ;;  %v4117_v33 = vld [vmem:[#allocation9_spill] sm:$0xff]  ;;  %v4126_v1 = vld [vmem:[#allocation18_spill] sm:$0xff] }
 0x60b   :  { %v3554_v12 = vadd.f32 %v1380_v52, %v1379_v10  ;;  %v4128_v10 = vld [vmem:[#allocation20_spill] sm:$0xff]  ;;  %v4129_v52 = vld [vmem:[#allocation21_spill] sm:$0xff] }
 0x60d   :  { %2428 = vtanh.f32 %v3554_v12 }
 0x61a   :  { %v2429_v62 = vpop.eup %2428 }
 0x61b   :  { %v1383_v34 = vmul.f32 %v2429_v62, %v2427_v59  ;;  %v4130_v59 = vld [vmem:[#allocation22_spill] sm:$0xff]  ;;  %v4131_v62 = vld [vmem:[#allocation23_spill] sm:$0xff] }
 0x61d   :  { %1449 = vmatmul.mubr.f32.vlgmr.msra.gmra.mxu0 %v1383_v34  ;;  %1520 = vmatmul.mubr.f32.vlgmr.msra.gmra.mxu1 %v1383_v34  ;;  %v4132_v34 = vld [vmem:[#allocation24_spill] sm:$0xff] }
 0x61e   :  { %1563 = vmatpush1.msra.mxu0 %v3277_v13  ;;  %1634 = vmatpush1.msra.mxu1 %v3280_v14 }
 0x61f   :  { %1564 = vmatprep.subr.mxu0 %v3283_v15  ;;  %1635 = vmatprep.subr.mxu1 %v3286_v53 }
 0x620   :  { %1565 = vmatpush1.msra.mxu0 %v3289_v16  ;;  %1636 = vmatpush1.msra.mxu1 %v3292_v17 }
 0x621   :  { %1566 = vmatprep.subr.mxu0 %v3295_v18  ;;  %1637 = vmatprep.subr.mxu1 %v3298_v19 }
 0x622   :  { %1567 = vmatpush1.msra.mxu0 %v3301_v20  ;;  %1638 = vmatpush1.msra.mxu1 %v3304_v21 }
 0x623   :  { %1568 = vmatprep.subr.mxu0 %v3307_v22  ;;  %1639 = vmatprep.subr.mxu1 %v3310_v23 }
 0x624   :  { %1569 = vmatpush1.msra.mxu0 %v3313_v24  ;;  %1640 = vmatpush1.msra.mxu1 %v3316_v25 }
 0x625   :  { %1570 = vmatprep.subr.mxu0 %v3319_v26  ;;  %1641 = vmatprep.subr.mxu1 %v3322_v27 }
 0x626   :  { %1571 = vmatpush1.msra.mxu0 %v3325_v28  ;;  %1642 = vmatpush1.msra.mxu1 %v3328_v29 }
 0x627   :  { %1572 = vmatprep.subr.mxu0 %v3331_v30  ;;  %1643 = vmatprep.subr.mxu1 %v3334_v32 }
 0x628   :  { %1573 = vmatpush1.msra.mxu0 %v3337_v35  ;;  %1644 = vmatpush1.msra.mxu1 %v3340_v36 }
 0x629   :  { %1574 = vmatprep.subr.mxu0 %v3343_v37  ;;  %1645 = vmatprep.subr.mxu1 %v3346_v38 }
 0x62a   :  { %1575 = vmatpush1.msra.mxu0 %v3349_v39  ;;  %1646 = vmatpush1.msra.mxu1 %v3352_v40 }
 0x62b   :  { %1576 = vmatprep.subr.mxu0 %v3355_v42  ;;  %1647 = vmatprep.subr.mxu1 %v3358_v43 }
 0x62c   :  { %1577 = vmatpush1.msra.mxu0 %v3361_v44  ;;  %1648 = vmatpush1.msra.mxu1 %v3364_v45 }
 0x62d   :  { %1578 = vmatprep.subr.mxu0 %v3367_v46  ;;  %1649 = vmatprep.subr.mxu1 %v3370_v47 }
 0x62e   :  { %1579 = vmatpush1.msra.mxu0 %v3373_v3  ;;  %1650 = vmatpush1.msra.mxu1 %v3376_v8 }
 0x62f   :  { %1580 = vmatprep.subr.mxu0 %v3379_v55  ;;  %1651 = vmatprep.subr.mxu1 %v3382_v0 }
 0x630   :  { %1581 = vmatpush1.msra.mxu0 %v3385_v6  ;;  %1652 = vmatpush1.msra.mxu1 %v3388_v54 }
 0x631   :  { %1582 = vmatprep.subr.mxu0 %v3391_v61  ;;  %1653 = vmatprep.subr.mxu1 %v3394_v57 }
 0x632   :  { %1583 = vmatpush1.msra.mxu0 %v3397_v49  ;;  %1654 = vmatpush1.msra.mxu1 %v4116_v56 }
 0x633   :  { %1584 = vmatprep.subr.mxu0 %v4117_v33  ;;  %1655 = vmatprep.subr.mxu1 %v4118_v9 }
 0x634   :  { %1585 = vmatpush1.msra.mxu0 %v4119_v11  ;;  %1656 = vmatpush1.msra.mxu1 %v4120_v60 }
 0x635   :  { %1586 = vmatprep.subr.mxu0 %v4121_v63  ;;  %1657 = vmatprep.subr.mxu1 %v4122_v2  ;;  %v4133_v2 = vld [vmem:[#allocation25_spill] sm:$0xff] }
 0x636   :  { %1587 = vmatpush1.msra.mxu0 %v4123_v58  ;;  %1658 = vmatpush1.msra.mxu1 %v4124_v4  ;;  %v4134_v58 = vld [vmem:[#allocation26_spill] sm:$0xff]  ;;  %v4135_v4 = vld [vmem:[#allocation27_spill] sm:$0xff] }
 0x637   :  { %1588 = vmatprep.subr.mxu0 %v4125_v50  ;;  %1659 = vmatprep.subr.mxu1 %v4126_v1  ;;  %v4136_v50 = vmov 0.0   ;;  %v4137_v1 = vld [vmem:[#allocation28_spill] sm:$0xff] }
 0x638   :  { %1589 = vmatpush1.msra.mxu0 %v4127_v5  ;;  %1660 = vmatpush1.msra.mxu1 %v4128_v10  ;;  %v4138_v10 = vld [vmem:[#allocation6_spill] sm:$0xff] }
 0x639   :  { %1590 = vmatprep.subr.mxu0 %v4129_v52  ;;  %1661 = vmatprep.subr.mxu1 %v4130_v59  ;;  %v4139_v52 = vld [vmem:[#allocation7_spill] sm:$0xff] }
 0x63a   :  { %1591 = vmatpush1.msra.mxu0 %v4131_v62  ;;  %1662 = vmatpush1.msra.mxu1 %v4132_v34  ;;  %v4140_v62 = vld [vmem:[#allocation34_spill] sm:$0xff]  ;;  %v4141_v34 = vld [vmem:[#allocation33_spill] sm:$0xff] }
 0x63b   :  { %1592 = vmatprep.subr.mxu0 %v4133_v2  ;;  %1663 = vmatprep.subr.mxu1 %v4134_v58  ;;  %v1526_v63 = vrot.slane %v4141_v34, 4 }
 0x63c   :  { %1593 = vmatpush1.msra.mxu0 %v4135_v4  ;;  %1626 = vmatprep.mubr.f32.mxu0 %v4136_v50  ;;  %v4142_v4 = vld [vmem:[#allocation35_spill] sm:$0xff] }
 0x63d   :  { %1664 = vmatpush1.msra.mxu1 %v4137_v1  ;;  %1697 = vmatprep.mubr.f32.mxu1 %v4136_v50  ;;  %v1527_v11 = vrot.slane %v4142_v4, 4 }
 0x63e   :  { %1740 = vmatprep.subr.mxu0 %v4138_v10  ;;  %1811 = vmatprep.subr.mxu1 %v4139_v52  ;;  %v1528_v52 = vrot.slane %v4115_v31, 4 }
 0x6dd   :  { %v1450_v59 = vpop.f32.mrf.mxu0  ;;  %v1521_v1 = vpop.f32.mrf.mxu1 }
 0x6de   :  { %v1451_v5 = vadd.f32 %v1450_v59, %v4140_v62  ;;  %v1522_v10 = vadd.f32 %v1521_v1, %v3016_v51 }
 0x6df   :  { %v1452_v2 = vpop.f32.mrf.mxu0  ;;  %v1523_v56 = vpop.f32.mrf.mxu1 }
 0x6e0   :  { %v1534_v60 = vadd.f32 %v1526_v63, %v1451_v5  ;;  %v1453_v58 = vadd.f32 %v1452_v2, %v4063_v41  ;;  %v1536_v59 = vadd.f32 %v1528_v52, %v1522_v10  ;;  %v1524_v34 = vadd.f32 %v1523_v56, %v3019_v7 }
 0x6e1   :  { %v1529_v63 = vrot.slane %v4089_v48, 4 }
 0x6e2   :  { %v2311_v9 = vmul.f32 -1.442695, %v1534_v60  ;;  %v1535_v33 = vadd.f32 %v1527_v11, %v1453_v58  ;;  %v2313_v62 = vmul.f32 -1.442695, %v1536_v59 }
 0x6e3   :  { %v1537_v5 = vadd.f32 %v1529_v63, %v1524_v34  ;;  %v4145_v63 = vld [vmem:[#allocation10_spill] sm:$0xff] }
 0x6e4   :  { %2430 = vpow2.f32 %v2311_v9  ;;  %v2312_v50 = vmul.f32 -1.442695, %v1535_v33 }
 0x6e6   :  { %2432 = vpow2.f32 %v2312_v50 }
 0x6e7   :  { %2434 = vpow2.f32 %v2313_v62 }
 0x6f1   :  { %v2431_v2 = vpop.eup %2430 }
 0x6f2   :  { %v1547_v4 = vadd.f32 1.0, %v2431_v2  ;;  %v4146_v2 = vld [vmem:[#allocation11_spill] sm:$0xff] }
 0x6f3   :  { %v2433_v60 = vpop.eup %2432 }
 0x6f4   :  { %2436 = vrcp.f32 %v1547_v4  ;;  %v1548_v9 = vadd.f32 1.0, %v2433_v60  ;;  %v2435_v33 = vpop.eup %2434  ;;  %v4144_v4 = vld [vmem:[#allocation9_spill] sm:$0xff] }
 0x6f5   :  { %2438 = vtanh.f32 %v1537_v5  ;;  %v1549_v1 = vadd.f32 1.0, %v2435_v33  ;;  %v4147_v5 = vld [vmem:[#allocation12_spill] sm:$0xff]  ;;  %v4148_v60 = vld [vmem:[#allocation13_spill] sm:$0xff]  ;;  %v4150_v33 = vld [vmem:[#allocation15_spill] sm:$0xff] }
 0x6f6   :  { %2440 = vrcp.f32 %v1548_v9  ;;  %v4149_v9 = vld [vmem:[#allocation14_spill] sm:$0xff] }
 0x6f7   :  { %2442 = vrcp.f32 %v1549_v1  ;;  %v4154_v1 = vld [vmem:[#allocation19_spill] sm:$0xff] }
 0x701   :  { %v2437_v11 = vpop.eup %2436 }
 0x702   :  { %v2439_v58 = vpop.eup %2438 }
 0x703   :  { %v2441_v50 = vpop.eup %2440  ;;  %v1558_v56 = vmul.f32 %v2439_v58, %v2437_v11  ;;  %v4151_v11 = vld [vmem:[#allocation16_spill] sm:$0xff]  ;;  %v4152_v58 = vld [vmem:[#allocation17_spill] sm:$0xff] }
 0x704   :  { %v1557_v10 = vmul.f32 %v2441_v50, %v3554_v12  ;;  %v2443_v34 = vpop.eup %2442  ;;  %v4143_v12 = vld [vmem:[#allocation8_spill] sm:$0xff]  ;;  %v4153_v50 = vld [vmem:[#allocation18_spill] sm:$0xff] }
 0x706   :  { %v3632_v52 = vadd.f32 %v1558_v56, %v1557_v10  ;;  %v4155_v10 = vld [vmem:[#allocation20_spill] sm:$0xff]  ;;  %v4156_v56 = vld [vmem:[#allocation21_spill] sm:$0xff] }
 0x708   :  { %2444 = vtanh.f32 %v3632_v52 }
 0x715   :  { %v2445_v59 = vpop.eup %2444 }
 0x716   :  { %v1561_v62 = vmul.f32 %v2445_v59, %v2443_v34  ;;  %v4157_v34 = vld [vmem:[#allocation22_spill] sm:$0xff]  ;;  %v4158_v59 = vld [vmem:[#allocation23_spill] sm:$0xff] }
 0x718   :  { %1627 = vmatmul.mubr.f32.vlgmr.msra.gmra.mxu0 %v1561_v62  ;;  %1698 = vmatmul.mubr.f32.vlgmr.msra.gmra.mxu1 %v1561_v62  ;;  %v4159_v62 = vld [vmem:[#allocation24_spill] sm:$0xff] }
 0x719   :  { %1741 = vmatpush1.msra.mxu0 %v3277_v13  ;;  %1812 = vmatpush1.msra.mxu1 %v3280_v14 }
 0x71a   :  { %1742 = vmatprep.subr.mxu0 %v3283_v15  ;;  %1813 = vmatprep.subr.mxu1 %v3286_v53 }
 0x71b   :  { %1743 = vmatpush1.msra.mxu0 %v3289_v16  ;;  %1814 = vmatpush1.msra.mxu1 %v3292_v17 }
 0x71c   :  { %1744 = vmatprep.subr.mxu0 %v3295_v18  ;;  %1815 = vmatprep.subr.mxu1 %v3298_v19 }
 0x71d   :  { %1745 = vmatpush1.msra.mxu0 %v3301_v20  ;;  %1816 = vmatpush1.msra.mxu1 %v3304_v21 }
 0x71e   :  { %1746 = vmatprep.subr.mxu0 %v3307_v22  ;;  %1817 = vmatprep.subr.mxu1 %v3310_v23 }
 0x71f   :  { %1747 = vmatpush1.msra.mxu0 %v3313_v24  ;;  %1818 = vmatpush1.msra.mxu1 %v3316_v25 }
 0x720   :  { %1748 = vmatprep.subr.mxu0 %v3319_v26  ;;  %1819 = vmatprep.subr.mxu1 %v3322_v27 }
 0x721   :  { %1749 = vmatpush1.msra.mxu0 %v3325_v28  ;;  %1820 = vmatpush1.msra.mxu1 %v3328_v29 }
 0x722   :  { %1750 = vmatprep.subr.mxu0 %v3331_v30  ;;  %1821 = vmatprep.subr.mxu1 %v3334_v32 }
 0x723   :  { %1751 = vmatpush1.msra.mxu0 %v3337_v35  ;;  %1822 = vmatpush1.msra.mxu1 %v3340_v36 }
 0x724   :  { %1752 = vmatprep.subr.mxu0 %v3343_v37  ;;  %1823 = vmatprep.subr.mxu1 %v3346_v38 }
 0x725   :  { %1753 = vmatpush1.msra.mxu0 %v3349_v39  ;;  %1824 = vmatpush1.msra.mxu1 %v3352_v40 }
 0x726   :  { %1754 = vmatprep.subr.mxu0 %v3355_v42  ;;  %1825 = vmatprep.subr.mxu1 %v3358_v43 }
 0x727   :  { %1755 = vmatpush1.msra.mxu0 %v3361_v44  ;;  %1826 = vmatpush1.msra.mxu1 %v3364_v45 }
 0x728   :  { %1756 = vmatprep.subr.mxu0 %v3367_v46  ;;  %1827 = vmatprep.subr.mxu1 %v3370_v47 }
 0x729   :  { %1757 = vmatpush1.msra.mxu0 %v3373_v3  ;;  %1828 = vmatpush1.msra.mxu1 %v3376_v8 }
 0x72a   :  { %1758 = vmatprep.subr.mxu0 %v3379_v55  ;;  %1829 = vmatprep.subr.mxu1 %v3382_v0 }
 0x72b   :  { %1759 = vmatpush1.msra.mxu0 %v3385_v6  ;;  %1830 = vmatpush1.msra.mxu1 %v3388_v54 }
 0x72c   :  { %1760 = vmatprep.subr.mxu0 %v3391_v61  ;;  %1831 = vmatprep.subr.mxu1 %v3394_v57 }
 0x72d   :  { %1761 = vmatpush1.msra.mxu0 %v3397_v49  ;;  %1832 = vmatpush1.msra.mxu1 %v4143_v12 }
 0x72e   :  { %1762 = vmatprep.subr.mxu0 %v4144_v4  ;;  %1833 = vmatprep.subr.mxu1 %v4145_v63 }
 0x72f   :  { %1763 = vmatpush1.msra.mxu0 %v4146_v2  ;;  %1834 = vmatpush1.msra.mxu1 %v4147_v5 }
 0x730   :  { %1764 = vmatprep.subr.mxu0 %v4148_v60  ;;  %1835 = vmatprep.subr.mxu1 %v4149_v9  ;;  %v4160_v9 = vld [vmem:[#allocation25_spill] sm:$0xff] }
 0x731   :  { %1765 = vmatpush1.msra.mxu0 %v4150_v33  ;;  %1836 = vmatpush1.msra.mxu1 %v4151_v11  ;;  %v4161_v33 = vld [vmem:[#allocation26_spill] sm:$0xff]  ;;  %v4162_v11 = vld [vmem:[#allocation27_spill] sm:$0xff] }
 0x732   :  { %1766 = vmatprep.subr.mxu0 %v4152_v58  ;;  %1837 = vmatprep.subr.mxu1 %v4153_v50  ;;  %v4163_v58 = vmov 0.0   ;;  %v4164_v50 = vld [vmem:[#allocation28_spill] sm:$0xff] }
 0x733   :  { %1767 = vmatpush1.msra.mxu0 %v4154_v1  ;;  %1838 = vmatpush1.msra.mxu1 %v4155_v10  ;;  %v4165_v10 = vld [vmem:[#allocation6_spill] sm:$0xff] }
 0x734   :  { %1768 = vmatprep.subr.mxu0 %v4156_v56  ;;  %1839 = vmatprep.subr.mxu1 %v4157_v34  ;;  %v4166_v56 = vld [vmem:[#allocation7_spill] sm:$0xff] }
 0x735   :  { %1769 = vmatpush1.msra.mxu0 %v4158_v59  ;;  %1840 = vmatpush1.msra.mxu1 %v4159_v62  ;;  %v4167_v59 = vld [vmem:[#allocation34_spill] sm:$0xff]  ;;  %v4168_v62 = vld [vmem:[#allocation33_spill] sm:$0xff] }
 0x736   :  { %1770 = vmatprep.subr.mxu0 %v4160_v9  ;;  %1841 = vmatprep.subr.mxu1 %v4161_v33  ;;  %v1704_v60 = vrot.slane %v4168_v62, 6 }
 0x737   :  { %1771 = vmatpush1.msra.mxu0 %v4162_v11  ;;  %1804 = vmatprep.mubr.f32.mxu0 %v4163_v58  ;;  %v4169_v11 = vld [vmem:[#allocation35_spill] sm:$0xff] }
 0x738   :  { %1842 = vmatpush1.msra.mxu1 %v4164_v50  ;;  %1875 = vmatprep.mubr.f32.mxu1 %v4163_v58  ;;  %v1705_v2 = vrot.slane %v4169_v11, 6 }
 0x739   :  { %1913 = vmatprep.subr.mxu0 %v4165_v10  ;;  %1984 = vmatprep.subr.mxu1 %v4166_v56  ;;  %v1706_v56 = vrot.slane %v4115_v31, 6 }
 0x7d8   :  { %v1628_v34 = vpop.f32.mrf.mxu0  ;;  %v1699_v50 = vpop.f32.mrf.mxu1 }
 0x7d9   :  { %v1629_v1 = vadd.f32 %v1628_v34, %v4167_v59  ;;  %v1700_v10 = vadd.f32 %v1699_v50, %v3016_v51 }
 0x7da   :  { %v1630_v9 = vpop.f32.mrf.mxu0  ;;  %v1701_v12 = vpop.f32.mrf.mxu1 }
 0x7db   :  { %v1712_v5 = vadd.f32 %v1704_v60, %v1629_v1  ;;  %v1631_v33 = vadd.f32 %v1630_v9, %v4063_v41  ;;  %v1714_v34 = vadd.f32 %v1706_v56, %v1700_v10  ;;  %v1702_v62 = vadd.f32 %v1701_v12, %v3019_v7 }
 0x7dc   :  { %v1707_v60 = vrot.slane %v4089_v48, 6 }
 0x7dd   :  { %v2314_v63 = vmul.f32 -1.442695, %v1712_v5  ;;  %v1713_v4 = vadd.f32 %v1705_v2, %v1631_v33  ;;  %v2316_v59 = vmul.f32 -1.442695, %v1714_v34 }
 0x7de   :  { %v1715_v1 = vadd.f32 %v1707_v60, %v1702_v62 }
 0x7df   :  { %2446 = vpow2.f32 %v2314_v63  ;;  %v2315_v58 = vmul.f32 -1.442695, %v1713_v4 }
 0x7e1   :  { %2448 = vpow2.f32 %v2315_v58 }
 0x7e2   :  { %2450 = vpow2.f32 %v2316_v59 }
 0x7ec   :  { %v2447_v9 = vpop.eup %2446 }
 0x7ed   :  { %v1725_v11 = vadd.f32 1.0, %v2447_v9 }
 0x7ee   :  { %v2449_v5 = vpop.eup %2448 }
 0x7ef   :  { %2452 = vrcp.f32 %v1725_v11  ;;  %v1726_v63 = vadd.f32 1.0, %v2449_v5  ;;  %v2451_v4 = vpop.eup %2450  ;;  %v4193_v11 = vld [vmem:[#allocation39_spill] sm:$0xff] }
 0x7f0   :  { %2454 = vtanh.f32 %v1715_v1  ;;  %v1727_v58 = vadd.f32 1.0, %v2451_v4  ;;  %vm1906_vm5 = vcmp.ge.s32.totalorder %v4193_v11, 32  ;;  %vm2079_vm6 = vcmp.ge.s32.totalorder %v4193_v11, 64 }
 0x7f1   :  { %2456 = vrcp.f32 %v1726_v63  ;;  %vm2251_vm7 = vcmp.ge.s32.totalorder %v4193_v11, 96 }
 0x7f2   :  { %2458 = vrcp.f32 %v1727_v58  ;;  %v2576_v58 = vld [vmem:[#allocation3 + $0x1e0] sm:$0xff] }
 0x7fc   :  { %v2453_v2 = vpop.eup %2452 }
 0x7fd   :  { %v2455_v33 = vpop.eup %2454 }
 0x7fe   :  { %v2457_v31 = vpop.eup %2456  ;;  %v1736_v12 = vmul.f32 %v2455_v33, %v2453_v2 }
 0x7ff   :  { %v1735_v50 = vmul.f32 %v2457_v31, %v3632_v52  ;;  %v2459_v48 = vpop.eup %2458 }
 0x801   :  { %v3710_v10 = vadd.f32 %v1736_v12, %v1735_v50  ;;  %v2577_v50 = vld [vmem:[#allocation3 + $0x1f0] sm:$0xff]  ;;  %v2578_v12 = vld [vmem:[#allocation3 + $0x1c8] sm:$0xff] }
 0x803   :  { %2460 = vtanh.f32 %v3710_v10 }
 0x810   :  { %v2461_v56 = vpop.eup %2460 }
 0x811   :  { %v3713_v59 = vmul.f32 %v2461_v56, %v2459_v48  ;;  %v2579_v48 = vld [vmem:[#allocation3 + $0x1d8] sm:$0xff]  ;;  %v2581_v56 = vld [vmem:[#allocation3 + $0x1d0] sm:$0xff] }
 0x813   :  { %1805 = vmatmul.mubr.f32.vlgmr.msra.gmra.mxu0 %v3713_v59  ;;  %1876 = vmatmul.mubr.f32.vlgmr.msra.gmra.mxu1 %v3713_v59 }
 0x814   :  { %1914 = vmatpush1.msra.mxu0 %v3277_v13  ;;  %1985 = vmatpush1.msra.mxu1 %v3280_v14  ;;  %v4170_v13 = vld [vmem:[#allocation8_spill] sm:$0xff]  ;;  %v4171_v14 = vld [vmem:[#allocation9_spill] sm:$0xff] }
 0x815   :  { %1915 = vmatprep.subr.mxu0 %v3283_v15  ;;  %1986 = vmatprep.subr.mxu1 %v3286_v53  ;;  %v4172_v15 = vld [vmem:[#allocation10_spill] sm:$0xff]  ;;  %v4173_v53 = vld [vmem:[#allocation11_spill] sm:$0xff] }
 0x816   :  { %1916 = vmatpush1.msra.mxu0 %v3289_v16  ;;  %1987 = vmatpush1.msra.mxu1 %v3292_v17  ;;  %v4174_v16 = vld [vmem:[#allocation12_spill] sm:$0xff]  ;;  %v4175_v17 = vld [vmem:[#allocation13_spill] sm:$0xff] }
 0x817   :  { %1917 = vmatprep.subr.mxu0 %v3295_v18  ;;  %1988 = vmatprep.subr.mxu1 %v3298_v19  ;;  %v4176_v18 = vld [vmem:[#allocation14_spill] sm:$0xff]  ;;  %v4177_v19 = vld [vmem:[#allocation15_spill] sm:$0xff] }
 0x818   :  { %1918 = vmatpush1.msra.mxu0 %v3301_v20  ;;  %1989 = vmatpush1.msra.mxu1 %v3304_v21  ;;  %v4178_v20 = vld [vmem:[#allocation16_spill] sm:$0xff]  ;;  %v4179_v21 = vld [vmem:[#allocation17_spill] sm:$0xff] }
 0x819   :  { %1919 = vmatprep.subr.mxu0 %v3307_v22  ;;  %1990 = vmatprep.subr.mxu1 %v3310_v23  ;;  %v4180_v22 = vld [vmem:[#allocation18_spill] sm:$0xff]  ;;  %v4181_v23 = vld [vmem:[#allocation19_spill] sm:$0xff] }
 0x81a   :  { %1920 = vmatpush1.msra.mxu0 %v3313_v24  ;;  %1991 = vmatpush1.msra.mxu1 %v3316_v25  ;;  %v4182_v24 = vld [vmem:[#allocation20_spill] sm:$0xff]  ;;  %v4183_v25 = vld [vmem:[#allocation21_spill] sm:$0xff] }
 0x81b   :  { %1921 = vmatprep.subr.mxu0 %v3319_v26  ;;  %1992 = vmatprep.subr.mxu1 %v3322_v27  ;;  %v4184_v26 = vld [vmem:[#allocation22_spill] sm:$0xff]  ;;  %v4185_v27 = vld [vmem:[#allocation23_spill] sm:$0xff] }
 0x81c   :  { %1922 = vmatpush1.msra.mxu0 %v3325_v28  ;;  %1993 = vmatpush1.msra.mxu1 %v3328_v29  ;;  %v4186_v28 = vld [vmem:[#allocation24_spill] sm:$0xff]  ;;  %v4187_v29 = vld [vmem:[#allocation25_spill] sm:$0xff] }
 0x81d   :  { %1923 = vmatprep.subr.mxu0 %v3331_v30  ;;  %1994 = vmatprep.subr.mxu1 %v3334_v32  ;;  %v4188_v30 = vld [vmem:[#allocation26_spill] sm:$0xff]  ;;  %v4189_v32 = vld [vmem:[#allocation27_spill] sm:$0xff] }
 0x81e   :  { %1924 = vmatpush1.msra.mxu0 %v3337_v35  ;;  %1995 = vmatpush1.msra.mxu1 %v3340_v36  ;;  %v4190_v35 = vmov 0.0   ;;  %v4191_v36 = vld [vmem:[#allocation28_spill] sm:$0xff] }
 0x81f   :  { %1925 = vmatprep.subr.mxu0 %v3343_v37  ;;  %1996 = vmatprep.subr.mxu1 %v3346_v38  ;;  %v2574_v37 = vld [vmem:[#allocation3 + $0x1e8] sm:$0xff]  ;;  %v2575_v38 = vld [vmem:[#allocation3 + $0x1f8] sm:$0xff] }
 0x820   :  { %1926 = vmatpush1.msra.mxu0 %v3349_v39  ;;  %1997 = vmatpush1.msra.mxu1 %v3352_v40  ;;  %v4192_v40 = vld [vmem:[#allocation34_spill] sm:$0xff] }
 0x821   :  { %1927 = vmatprep.subr.mxu0 %v3355_v42  ;;  %1998 = vmatprep.subr.mxu1 %v3358_v43 }
 0x822   :  { %1928 = vmatpush1.msra.mxu0 %v3361_v44  ;;  %1999 = vmatpush1.msra.mxu1 %v3364_v45 }
 0x823   :  { %1929 = vmatprep.subr.mxu0 %v3367_v46  ;;  %2000 = vmatprep.subr.mxu1 %v3370_v47 }
 0x824   :  { %1930 = vmatpush1.msra.mxu0 %v3373_v3  ;;  %2001 = vmatpush1.msra.mxu1 %v3376_v8 }
 0x825   :  { %1931 = vmatprep.subr.mxu0 %v3379_v55  ;;  %2002 = vmatprep.subr.mxu1 %v3382_v0 }
 0x826   :  { %1932 = vmatpush1.msra.mxu0 %v3385_v6  ;;  %2003 = vmatpush1.msra.mxu1 %v3388_v54 }
 0x827   :  { %1933 = vmatprep.subr.mxu0 %v3391_v61  ;;  %2004 = vmatprep.subr.mxu1 %v3394_v57 }
 0x828   :  { %1934 = vmatpush1.msra.mxu0 %v3397_v49  ;;  %2005 = vmatpush1.msra.mxu1 %v4170_v13  ;;  %v2582_v13 = vld [vmem:[#allocation3 + $0x1a8] sm:$0xff] }
 0x829   :  { %1935 = vmatprep.subr.mxu0 %v4171_v14  ;;  %2006 = vmatprep.subr.mxu1 %v4172_v15  ;;  %v2584_v14 = vld [vmem:[#allocation3 + $0x1a0] sm:$0xff]  ;;  %v2585_v15 = vld [vmem:[#allocation3 + $0x1b0] sm:$0xff] }
 0x82a   :  { %1936 = vmatpush1.msra.mxu0 %v4173_v53  ;;  %2007 = vmatpush1.msra.mxu1 %v4174_v16  ;;  %v2586_v53 = vld [vmem:[#allocation3 + $0x188] sm:$0xff]  ;;  %v2587_v16 = vld [vmem:[#allocation3 + $0x198] sm:$0xff] }
 0x82b   :  { %1937 = vmatprep.subr.mxu0 %v4175_v17  ;;  %2008 = vmatprep.subr.mxu1 %v4176_v18  ;;  %v2588_v17 = vld [vmem:[#allocation3 + $0x180] sm:$0xff]  ;;  %v2589_v18 = vld [vmem:[#allocation3 + $0x190] sm:$0xff] }
 0x82c   :  { %1938 = vmatpush1.msra.mxu0 %v4177_v19  ;;  %2009 = vmatpush1.msra.mxu1 %v4178_v20  ;;  %v2590_v19 = vld [vmem:[#allocation3 + $0x168] sm:$0xff]  ;;  %v2591_v20 = vld [vmem:[#allocation3 + $0x178] sm:$0xff] }
 0x82d   :  { %1939 = vmatprep.subr.mxu0 %v4179_v21  ;;  %2010 = vmatprep.subr.mxu1 %v4180_v22  ;;  %v2592_v21 = vld [vmem:[#allocation3 + $0x160] sm:$0xff]  ;;  %v2593_v22 = vld [vmem:[#allocation3 + $0x170] sm:$0xff] }
 0x82e   :  { %1940 = vmatpush1.msra.mxu0 %v4181_v23  ;;  %2011 = vmatpush1.msra.mxu1 %v4182_v24  ;;  %v2594_v23 = vld [vmem:[#allocation3 + $0x148] sm:$0xff]  ;;  %v2595_v24 = vld [vmem:[#allocation3 + $0x158] sm:$0xff] }
 0x82f   :  { %1941 = vmatprep.subr.mxu0 %v4183_v25  ;;  %2012 = vmatprep.subr.mxu1 %v4184_v26  ;;  %v2596_v25 = vld [vmem:[#allocation3 + $0x140] sm:$0xff]  ;;  %v2597_v26 = vld [vmem:[#allocation3 + $0x150] sm:$0xff] }
 0x830   :  { %1942 = vmatpush1.msra.mxu0 %v4185_v27  ;;  %2013 = vmatpush1.msra.mxu1 %v4186_v28  ;;  %v2598_v27 = vld [vmem:[#allocation3 + $0x128] sm:$0xff]  ;;  %v2599_v28 = vld [vmem:[#allocation3 + $0x138] sm:$0xff] }
 0x831   :  { %1943 = vmatprep.subr.mxu0 %v4187_v29  ;;  %2014 = vmatprep.subr.mxu1 %v4188_v30  ;;  %v2600_v29 = vld [vmem:[#allocation3 + $0x120] sm:$0xff]  ;;  %v2601_v30 = vld [vmem:[#allocation3 + $0x130] sm:$0xff] }
 0x832   :  { %1944 = vmatpush1.msra.mxu0 %v4189_v32  ;;  %1977 = vmatprep.mubr.f32.mxu0 %v4190_v35  ;;  %v2602_v32 = vld [vmem:[#allocation3 + $0x108] sm:$0xff] }
 0x833   :  { %2015 = vmatpush1.msra.mxu1 %v4191_v36  ;;  %2048 = vmatprep.mubr.f32.mxu1 %v4190_v35  ;;  %v2603_v36 = vld [vmem:[#allocation3 + $0x118] sm:$0xff] }
 0x834   :  { %2085 = vmatprep.subr.mxu0 %v2574_v37  ;;  %2156 = vmatprep.subr.mxu1 %v2575_v38  ;;  %v2604_v37 = vld [vmem:[#allocation3 + $0x100] sm:$0xff]  ;;  %v2605_v38 = vld [vmem:[#allocation3 + $0x110] sm:$0xff] }
 0x8d3   :  { %v1806_v39 = vpop.f32.mrf.mxu0  ;;  %v1877_v47 = vpop.f32.mrf.mxu1 }
 0x8d4   :  { %v1807_v42 = vadd.f32 %v1806_v39, %v4192_v40  ;;  %v1878_v3 = vadd.f32 %v1877_v47, %v3016_v51  ;;  %v2606_v39 = vld [vmem:[#allocation3 + $0xe8] sm:$0xff]  ;;  %v2612_v47 = vld [vmem:[#allocation3 + $0xc0] sm:$0xff] }
 0x8d5   :  { %v1808_v43 = vpop.f32.mrf.mxu0  ;;  %v1879_v8 = vpop.f32.mrf.mxu1 }
 0x8d6   :  { %v2317_v44 = vmul.f32 -1.442695, %v1807_v42  ;;  %v1809_v45 = vadd.f32 %v1808_v43, %v4063_v41  ;;  %v2319_v55 = vmul.f32 -1.442695, %v1878_v3  ;;  %v1880_v6 = vadd.f32 %v1879_v8, %v3019_v7  ;;  %v2607_v42 = vld [vmem:[#allocation3 + $0xf8] sm:$0xff]  ;;  %v2608_v43 = vld [vmem:[#allocation3 + $0xe0] sm:$0xff] }
 0x8d7   :  { %v2613_v3 = vld [vmem:[#allocation3 + $0xd0] sm:$0xff]  ;;  %v2614_v8 = vld [vmem:[#allocation3 + $0xa8] sm:$0xff] }
 0x8d8   :  { %2462 = vpow2.f32 %v2317_v44  ;;  %v2318_v46 = vmul.f32 -1.442695, %v1809_v45  ;;  %v2609_v44 = vld [vmem:[#allocation3 + $0xf0] sm:$0xff]  ;;  %v2610_v45 = vld [vmem:[#allocation3 + $0xc8] sm:$0xff] }
 0x8da   :  { %2464 = vpow2.f32 %v2318_v46  ;;  %v2611_v46 = vld [vmem:[#allocation3 + $0xd8] sm:$0xff] }
 0x8db   :  { %2466 = vpow2.f32 %v2319_v55  ;;  %v2615_v55 = vld [vmem:[#allocation3 + $0xb8] sm:$0xff] }
 0x8e5   :  { %v2463_v0 = vpop.eup %2462 }
 0x8e6   :  { %v1891_v54 = vadd.f32 1.0, %v2463_v0  ;;  %v2616_v0 = vld [vmem:[#allocation3 + $0xa0] sm:$0xff] }
 0x8e7   :  { %v2465_v61 = vpop.eup %2464 }
 0x8e8   :  { %2468 = vrcp.f32 %v1891_v54  ;;  %v1892_v57 = vadd.f32 1.0, %v2465_v61  ;;  %v2467_v49 = vpop.eup %2466  ;;  %v2618_v54 = vld [vmem:[#allocation3 + $0x88] sm:$0xff]  ;;  %v2619_v61 = vld [vmem:[#allocation3 + $0x98] sm:$0xff] }
 0x8e9   :  { %2470 = vtanh.f32 %v1880_v6  ;;  %v1893_v60 = vadd.f32 1.0, %v2467_v49  ;;  %v2617_v6 = vld [vmem:[#allocation3 + $0xb0] sm:$0xff] }
 0x8ea   :  { %2472 = vrcp.f32 %v1892_v57  ;;  %v2620_v57 = vld [vmem:[#allocation3 + $0x80] sm:$0xff]  ;;  %v2621_v49 = vld [vmem:[#allocation3 + $0x90] sm:$0xff] }
 0x8eb   :  { %2474 = vrcp.f32 %v1893_v60  ;;  %v2625_v60 = vld [vmem:[#allocation3 + $0x70] sm:$0xff] }
 0x8f5   :  { %v2469_v52 = vpop.eup %2468 }
 0x8f6   :  { %v2471_v34 = vpop.eup %2470 }
 0x8f7   :  { %v2473_v62 = vpop.eup %2472  ;;  %v1902_v1 = vmul.f32 %v2471_v34, %v2469_v52  ;;  %v2622_v52 = vld [vmem:[#allocation3 + $0x68] sm:$0xff]  ;;  %v2623_v34 = vld [vmem:[#allocation3 + $0x78] sm:$0xff] }
 0x8f8   :  { %v1901_v9 = vmul.f32 %v2473_v62, %v3710_v10  ;;  %v2475_v4 = vpop.eup %2474  ;;  %v2624_v62 = vld [vmem:[#allocation3 + $0x60] sm:$0xff] }
 0x8fa   :  { %v1903_v5 = vadd.f32 %v1902_v1, %v1901_v9  ;;  %v2626_v9 = vld [vmem:[#allocation3 + $0x48] sm:$0xff]  ;;  %v2627_v1 = vld [vmem:[#allocation3 + $0x58] sm:$0xff] }
 0x8fc   :  { %2476 = vtanh.f32 %v1903_v5  ;;  %v3788_v63 = vsel %vm1906_vm5, %v1903_v5, %v3710_v10  ;;  %v2580_v10 = vld [vmem:[#allocation3 + $0x1c0] sm:$0xff] }
 0x8fd   :  { %v2628_v5 = vld [vmem:[#allocation3 + $0x40] sm:$0xff] }
 0x909   :  { %v2477_v2 = vpop.eup %2476 }
 0x90a   :  { %v1905_v33 = vmul.f32 %v2477_v2, %v2475_v4  ;;  %v2629_v4 = vld [vmem:[#allocation3 + $0x50] sm:$0xff]  ;;  %v2630_v2 = vld [vmem:[#allocation3 + $0x28] sm:$0xff] }
 0x90c   :  { %v3791_v31 = vsel %vm1906_vm5, %v1905_v33, %v3713_v59  ;;  %v2583_v59 = vld [vmem:[#allocation3 + $0x1b8] sm:$0xff] }
 0x90d   :  { %1978 = vmatmul.mubr.f32.vlgmr.msra.gmra.mxu0 %v3791_v31  ;;  %2049 = vmatmul.mubr.f32.vlgmr.msra.gmra.mxu1 %v3791_v31  ;;  %v2631_v33 = vld [vmem:[#allocation3 + $0x38] sm:$0xff] }
 0x90e   :  { %2086 = vmatpush1.msra.mxu0 %v2576_v58  ;;  %2157 = vmatpush1.msra.mxu1 %v2577_v50  ;;  %v2632_v58 = vld [vmem:[#allocation3 + $0x20] sm:$0xff]  ;;  %v2633_v50 = vld [vmem:[#allocation3 + $0x30] sm:$0xff] }
 0x90f   :  { %2087 = vmatprep.subr.mxu0 %v2578_v12  ;;  %2158 = vmatprep.subr.mxu1 %v2579_v48  ;;  %v2634_v12 = vld [vmem:[#allocation3 + $0x8] sm:$0xff]  ;;  %v2635_v48 = vld [vmem:[#allocation3 + $0x18] sm:$0xff] }
 0x910   :  { %2088 = vmatpush1.msra.mxu0 %v2580_v10  ;;  %2159 = vmatpush1.msra.mxu1 %v2581_v56  ;;  %v2636_v10 = vld [vmem:[#allocation3] sm:$0xff]  ;;  %v2637_v56 = vld [vmem:[#allocation3 + $0x10] sm:$0xff] }
 0x911   :  { %2089 = vmatprep.subr.mxu0 %v2582_v13  ;;  %2160 = vmatprep.subr.mxu1 %v2583_v59 }
 0x912   :  { %2090 = vmatpush1.msra.mxu0 %v2584_v14  ;;  %2161 = vmatpush1.msra.mxu1 %v2585_v15 }
 0x913   :  { %2091 = vmatprep.subr.mxu0 %v2586_v53  ;;  %2162 = vmatprep.subr.mxu1 %v2587_v16 }
 0x914   :  { %2092 = vmatpush1.msra.mxu0 %v2588_v17  ;;  %2163 = vmatpush1.msra.mxu1 %v2589_v18 }
 0x915   :  { %2093 = vmatprep.subr.mxu0 %v2590_v19  ;;  %2164 = vmatprep.subr.mxu1 %v2591_v20 }
 0x916   :  { %2094 = vmatpush1.msra.mxu0 %v2592_v21  ;;  %2165 = vmatpush1.msra.mxu1 %v2593_v22 }
 0x917   :  { %2095 = vmatprep.subr.mxu0 %v2594_v23  ;;  %2166 = vmatprep.subr.mxu1 %v2595_v24 }
 0x918   :  { %2096 = vmatpush1.msra.mxu0 %v2596_v25  ;;  %2167 = vmatpush1.msra.mxu1 %v2597_v26 }
 0x919   :  { %2097 = vmatprep.subr.mxu0 %v2598_v27  ;;  %2168 = vmatprep.subr.mxu1 %v2599_v28 }
 0x91a   :  { %2098 = vmatpush1.msra.mxu0 %v2600_v29  ;;  %2169 = vmatpush1.msra.mxu1 %v2601_v30 }
 0x91b   :  { %2099 = vmatprep.subr.mxu0 %v2602_v32  ;;  %2170 = vmatprep.subr.mxu1 %v2603_v36 }
 0x91c   :  { %2100 = vmatpush1.msra.mxu0 %v2604_v37  ;;  %2171 = vmatpush1.msra.mxu1 %v2605_v38 }
 0x91d   :  { %2101 = vmatprep.subr.mxu0 %v2606_v39  ;;  %2172 = vmatprep.subr.mxu1 %v2607_v42 }
 0x91e   :  { %2102 = vmatpush1.msra.mxu0 %v2608_v43  ;;  %2173 = vmatpush1.msra.mxu1 %v2609_v44 }
 0x91f   :  { %2103 = vmatprep.subr.mxu0 %v2610_v45  ;;  %2174 = vmatprep.subr.mxu1 %v2611_v46 }
 0x920   :  { %2104 = vmatpush1.msra.mxu0 %v2612_v47  ;;  %2175 = vmatpush1.msra.mxu1 %v2613_v3 }
 0x921   :  { %2105 = vmatprep.subr.mxu0 %v2614_v8  ;;  %2176 = vmatprep.subr.mxu1 %v2615_v55 }
 0x922   :  { %2106 = vmatpush1.msra.mxu0 %v2616_v0  ;;  %2177 = vmatpush1.msra.mxu1 %v2617_v6 }
 0x923   :  { %2107 = vmatprep.subr.mxu0 %v2618_v54  ;;  %2178 = vmatprep.subr.mxu1 %v2619_v61 }
 0x924   :  { %2108 = vmatpush1.msra.mxu0 %v2620_v57  ;;  %2179 = vmatpush1.msra.mxu1 %v2621_v49 }
 0x925   :  { %2109 = vmatprep.subr.mxu0 %v2622_v52  ;;  %2180 = vmatprep.subr.mxu1 %v2623_v34 }
 0x926   :  { %2110 = vmatpush1.msra.mxu0 %v2624_v62  ;;  %2181 = vmatpush1.msra.mxu1 %v2625_v60 }
 0x927   :  { %2111 = vmatprep.subr.mxu0 %v2626_v9  ;;  %2182 = vmatprep.subr.mxu1 %v2627_v1 }
 0x928   :  { %2112 = vmatpush1.msra.mxu0 %v2628_v5  ;;  %2183 = vmatpush1.msra.mxu1 %v2629_v4  ;;  %v2326_v4 = vld [vmem:[%s3820_s4] ss:$0 sm:$0xff] }
 0x929   :  { %2113 = vmatprep.subr.mxu0 %v2630_v2  ;;  %2184 = vmatprep.subr.mxu1 %v2631_v33 }
 0x92a   :  { %2114 = vmatpush1.msra.mxu0 %v2632_v58  ;;  %2185 = vmatpush1.msra.mxu1 %v2633_v50  ;;  %v2327_v50 = vld [vmem:[#allocation2] ss:$0 sm:$0xff] }
 0x92b   :  { %2115 = vmatprep.subr.mxu0 %v2634_v12  ;;  %2186 = vmatprep.subr.mxu1 %v2635_v48 }
 0x92c   :  { %2116 = vmatpush1.msra.mxu0 %v2636_v10  ;;  %2149 = vmatprep.mubr.f32.mxu0 %v4190_v35 }
 0x92d   :  { %2187 = vmatpush1.msra.mxu1 %v2637_v56  ;;  %2220 = vmatprep.mubr.f32.mxu1 %v4190_v35 }
 0x9cd   :  { %v1979_v13 = vpop.f32.mrf.mxu0  ;;  %v2050_v17 = vpop.f32.mrf.mxu1 }
 0x9ce   :  { %v1980_v59 = vadd.f32 %v1979_v13, %v4192_v40  ;;  %v2051_v18 = vadd.f32 %v2050_v17, %v3016_v51 }
 0x9cf   :  { %v1981_v14 = vpop.f32.mrf.mxu0  ;;  %v2052_v19 = vpop.f32.mrf.mxu1 }
 0x9d0   :  { %v2320_v15 = vmul.f32 -1.442695, %v1980_v59  ;;  %v1982_v53 = vadd.f32 %v1981_v14, %v4063_v41  ;;  %v2322_v20 = vmul.f32 -1.442695, %v2051_v18  ;;  %v2053_v22 = vadd.f32 %v2052_v19, %v3019_v7 }
 0x9d2   :  { %2478 = vpow2.f32 %v2320_v15  ;;  %v2321_v16 = vmul.f32 -1.442695, %v1982_v53 }
 0x9d4   :  { %2480 = vpow2.f32 %v2321_v16 }
 0x9d5   :  { %2482 = vpow2.f32 %v2322_v20 }
 0x9df   :  { %v2479_v21 = vpop.eup %2478 }
 0x9e0   :  { %v2064_v23 = vadd.f32 1.0, %v2479_v21 }
 0x9e1   :  { %v2481_v35 = vpop.eup %2480 }
 0x9e2   :  { %2484 = vrcp.f32 %v2064_v23  ;;  %v2065_v24 = vadd.f32 1.0, %v2481_v35  ;;  %v2483_v25 = vpop.eup %2482 }
 0x9e3   :  { %2486 = vtanh.f32 %v2053_v22  ;;  %v2066_v29 = vadd.f32 1.0, %v2483_v25 }
 0x9e4   :  { %2488 = vrcp.f32 %v2065_v24 }
 0x9e5   :  { %2490 = vrcp.f32 %v2066_v29 }
 0x9ef   :  { %v2485_v26 = vpop.eup %2484 }
 0x9f0   :  { %v2487_v27 = vpop.eup %2486 }
 0x9f1   :  { %v2489_v28 = vpop.eup %2488  ;;  %v2075_v32 = vmul.f32 %v2487_v27, %v2485_v26 }
 0x9f2   :  { %v2074_v30 = vmul.f32 %v2489_v28, %v3788_v63  ;;  %v2491_v38 = vpop.eup %2490 }
 0x9f4   :  { %v2076_v36 = vadd.f32 %v2075_v32, %v2074_v30 }
 0x9f6   :  { %2492 = vtanh.f32 %v2076_v36  ;;  %v2083_v37 = vsel %vm2079_vm6, %v2076_v36, %v3788_v63 }
 0xa03   :  { %v2493_v39 = vpop.eup %2492 }
 0xa04   :  { %v2078_v42 = vmul.f32 %v2493_v39, %v2491_v38 }
 0xa06   :  { %v2084_v43 = vsel %vm2079_vm6, %v2078_v42, %v3791_v31 }
 0xa07   :  { %2150 = vmatmul.mubr.f32.vlgmr.msra.gmra.mxu0 %v2084_v43  ;;  %2221 = vmatmul.mubr.f32.vlgmr.msra.gmra.mxu1 %v2084_v43 }
 0xac7   :  { %v2151_v44 = vpop.f32.mrf.mxu0  ;;  %v2222_v55 = vpop.f32.mrf.mxu1 }
 0xac8   :  { %v2152_v45 = vadd.f32 %v2151_v44, %v4192_v40  ;;  %v2223_v63 = vadd.f32 %v2222_v55, %v3016_v51 }
 0xac9   :  { %v2153_v46 = vpop.f32.mrf.mxu0  ;;  %v2224_v0 = vpop.f32.mrf.mxu1 }
 0xaca   :  { %v2323_v47 = vmul.f32 -1.442695, %v2152_v45  ;;  %v2154_v3 = vadd.f32 %v2153_v46, %v4063_v41  ;;  %v2325_v6 = vmul.f32 -1.442695, %v2223_v63  ;;  %v2225_v31 = vadd.f32 %v2224_v0, %v3019_v7 }
 0xacc   :  { %2494 = vpow2.f32 %v2323_v47  ;;  %v2324_v8 = vmul.f32 -1.442695, %v2154_v3 }
 0xace   :  { %2496 = vpow2.f32 %v2324_v8 }
 0xacf   :  { %2498 = vpow2.f32 %v2325_v6 }
 0xad9   :  { %v2495_v54 = vpop.eup %2494 }
 0xada   :  { %v2236_v61 = vadd.f32 1.0, %v2495_v54 }
 0xadb   :  { %v2497_v57 = vpop.eup %2496 }
 0xadc   :  { %2500 = vrcp.f32 %v2236_v61  ;;  %v2237_v40 = vadd.f32 1.0, %v2497_v57  ;;  %v2499_v49 = vpop.eup %2498 }
 0xadd   :  { %2502 = vtanh.f32 %v2225_v31  ;;  %v2238_v62 = vadd.f32 1.0, %v2499_v49 }
 0xade   :  { %2504 = vrcp.f32 %v2237_v40 }
 0xadf   :  { %2506 = vrcp.f32 %v2238_v62 }
 0xae9   :  { %v2501_v41 = vpop.eup %2500 }
 0xaea   :  { %v2503_v52 = vpop.eup %2502 }
 0xaeb   :  { %v2505_v34 = vpop.eup %2504  ;;  %v2247_v9 = vmul.f32 %v2503_v52, %v2501_v41 }
 0xaec   :  { %v2246_v60 = vmul.f32 %v2505_v34, %v2083_v37  ;;  %v2507_v1 = vpop.eup %2506 }
 0xaee   :  { %v2248_v51 = vadd.f32 %v2247_v9, %v2246_v60 }
 0xaf0   :  { %2508 = vtanh.f32 %v2248_v51 }
 0xafd   :  { %v2509_v5 = vpop.eup %2508 }
 0xafe   :  { %v2250_v7 = vmul.f32 %v2509_v5, %v2507_v1 }
 0xb00   :  { %v2255_v2 = vsel %vm2251_vm7, %v2250_v7, %v2084_v43 }
 0xb01   :  { %v2263_v33 = vmul.f32 %v2326_v4, %v2255_v2 }
 0xb03   :  { %v2265_v58 = vsel %vm2264_vm8, %v2263_v33, 0.0 }
 0xb04   :  { %2266 = vadd.xlane.f32.xlu0 %v2265_v58 }
 0xb8d   :  { %v2267_v12 = vpop.xlane.xlu0 %2266 }
 0xb8e   :  { %v2275_v48 = vadd.f32 %v2327_v50, %v2267_v12 }
 0xb90   :  { %2277 = vst.msk [vmem:[%s3822_s6] sm:$0x3] %vm2276_vm9, %v2275_v48 }
 0xb91   :  { %2282 = vsyncpa [#allocation4], 1 }

</bundles_post_ra>
